<compile_context>
chip_gen: v5e
topology: v5e:2x2
jax: 0.10.0
libtpu: 0.0.40
codegen_flags: <defaults>
</compile_context>

<pallas_src>
import functools

import numpy as np
import jax
import jax.numpy as jnp
from jax.experimental import pallas as pl
from jax.experimental.pallas import tpu as pltpu


# ----------------------------------------------------------------------------
# sincos positional embedding (identical to the reference numpy code)
# ----------------------------------------------------------------------------
def get_1d_sincos_pos_embed_from_grid(embed_dim, pos):
    assert embed_dim % 2 == 0
    omega = np.arange(embed_dim // 2, dtype=np.float32)
    omega /= embed_dim / 2.0
    omega = 1.0 / 10000 ** omega
    pos = pos.reshape(-1)
    out = np.einsum('m,d->md', pos, omega)
    return np.concatenate([np.sin(out), np.cos(out)], axis=1)


def get_2d_sincos_pos_embed_from_grid(embed_dim, grid):
    assert embed_dim % 2 == 0
    emb_h = get_1d_sincos_pos_embed_from_grid(embed_dim // 2, grid[0])
    emb_w = get_1d_sincos_pos_embed_from_grid(embed_dim // 2, grid[1])
    return np.concatenate([emb_h, emb_w], axis=1)


def get_2d_sincos_pos_embed(embed_dim, grid_size, cls_token=False):
    grid_h = np.arange(grid_size, dtype=np.float32)
    grid_w = np.arange(grid_size, dtype=np.float32)
    grid = np.meshgrid(grid_w, grid_h)
    grid = np.stack(grid, axis=0).reshape([2, 1, grid_size, grid_size])
    pos_embed = get_2d_sincos_pos_embed_from_grid(embed_dim, grid)
    if cls_token:
        pos_embed = np.concatenate([np.zeros([1, embed_dim]), pos_embed], axis=0)
    return pos_embed


# ----------------------------------------------------------------------------
# Generation-aware tiling / VMEM configuration
# ----------------------------------------------------------------------------
def _vmem_capacity_bytes():
    try:
        return int(pltpu.get_tpu_info().vmem_capacity_bytes)
    except Exception:
        return 64 * 1024 * 1024          # conservative default (v7x-sized)


_VMEM_CAP = _vmem_capacity_bytes()
if _VMEM_CAP >= 96 * 1024 * 1024:        # v5e / v6e / v5p: 128 MiB VMEM
    _ROW_TILE_CAP = 512                  # multiple of 8   (sublanes)
    _COL_TILE_CAP = 1024                 # multiple of 128 (lanes)
    _VMEM_LIMIT = 96 * 1024 * 1024
else:                                    # v7x: 64 MiB VMEM per TensorCore
    _ROW_TILE_CAP = 256
    _COL_TILE_CAP = 512
    _VMEM_LIMIT = 48 * 1024 * 1024


def _row_tile(m):
    # full dim is always a legal block; otherwise use the 8-aligned cap
    return m if m <= _ROW_TILE_CAP else _ROW_TILE_CAP


def _col_tile(n):
    return n if n <= _COL_TILE_CAP else _COL_TILE_CAP


def _as_bf16(x):
    # resolved at trace time; no-op if the operand is already bf16
    return x if x.dtype == jnp.bfloat16 else x.astype(jnp.bfloat16)


# ----------------------------------------------------------------------------
# Fused (LayerNorm) + Linear kernel.  LayerNorm (or the bf16 cast of x) is
# computed ONCE per row block at col-tile j == 0 into a bf16 VMEM scratch and
# reused for every subsequent column tile of that row block.
# ----------------------------------------------------------------------------
def _fused_linear_kernel(*refs, use_ln, eps):
    if use_ln:
        x_ref, g_ref, be_ref, w_ref, b_ref, o_ref, xn_ref = refs
    else:
        x_ref, w_ref, b_ref, o_ref, xn_ref = refs

    @pl.when(pl.program_id(1) == 0)
    def _():
        x = x_ref[...].astype(jnp.float32)
        if use_ln:
            mean = jnp.mean(x, axis=-1, keepdims=True)
            var = jnp.mean(jnp.square(x - mean), axis=-1, keepdims=True)
            x = (x - mean) * jax.lax.rsqrt(var + eps)
            x = x * g_ref[...].astype(jnp.float32) + be_ref[...].astype(jnp.float32)
        xn_ref[...] = x.astype(jnp.bfloat16)

    y = jnp.dot(xn_ref[...], _as_bf16(w_ref[...]),
                preferred_element_type=jnp.float32)
    y = y + b_ref[...].astype(jnp.float32)
    o_ref[...] = y.astype(o_ref.dtype)


def fused_linear(x2d, w, b, *, gamma=None, beta=None, eps=1e-5):
    """y = LN?(x) @ w + b.   x2d: (M, K) -> (M, N); w expected bf16.

    Grid = (row tiles [parallel], col tiles [arbitrary]).  The K axis stays
    whole per block so LayerNorm fuses; normalized rows are cached in a bf16
    VMEM scratch across column tiles.  Padded rows from pl.cdiv grids read
    undefined data through LN but only land in discarded output rows (benign).
    """
    M, K = x2d.shape
    Kw, N = w.shape
    assert K == Kw
    use_ln = gamma is not None
    tm = _row_tile(M)
    tn = _col_tile(N)
    grid = (pl.cdiv(M, tm), pl.cdiv(N, tn))

    in_specs = [pl.BlockSpec((tm, K), lambda i, j: (i, 0))]
    inputs = [x2d]
    if use_ln:
        in_specs += [pl.BlockSpec((1, K), lambda i, j: (0, 0)),
                     pl.BlockSpec((1, K), lambda i, j: (0, 0))]
        inputs += [gamma.reshape(1, K), beta.reshape(1, K)]
    in_specs += [pl.BlockSpec((K, tn), lambda i, j: (0, j)),
                 pl.BlockSpec((1, tn), lambda i, j: (0, j))]
    inputs += [w, b.reshape(1, N)]

    kernel = functools.partial(_fused_linear_kernel, use_ln=use_ln, eps=eps)
    return pl.pallas_call(
        kernel,
        out_shape=jax.ShapeDtypeStruct((M, N), x2d.dtype),
        grid=grid,
        in_specs=in_specs,
        out_specs=pl.BlockSpec((tm, tn), lambda i, j: (i, j)),
        scratch_shapes=[pltpu.VMEM((tm, K), jnp.bfloat16)],
        compiler_params=pltpu.CompilerParams(
            dimension_semantics=("parallel", "arbitrary"),
            vmem_limit_bytes=_VMEM_LIMIT),
    )(*inputs)


# ----------------------------------------------------------------------------
# Fused MLP block kernel: LN -> fc1 -> GELU -> fc2 -> +residual
# (hidden activation stays in VMEM, never written to HBM)
# ----------------------------------------------------------------------------
def _fused_mlp_kernel(x_ref, g_ref, be_ref, w1_ref, b1_ref, w2_ref, b2_ref,
                      r_ref, o_ref, *, eps):
    x = x_ref[...].astype(jnp.float32)
    mean = jnp.mean(x, axis=-1, keepdims=True)
    var = jnp.mean(jnp.square(x - mean), axis=-1, keepdims=True)
    xn = (x - mean) * jax.lax.rsqrt(var + eps)
    xn = xn * g_ref[...].astype(jnp.float32) + be_ref[...].astype(jnp.float32)

    h = jnp.dot(xn.astype(jnp.bfloat16), _as_bf16(w1_ref[...]),
                preferred_element_type=jnp.float32)
    h = h + b1_ref[...].astype(jnp.float32)
    # TODO(synk): nn.GELU default is exact-erf GELU; tanh approximation used
    # (guaranteed Mosaic lowering), |diff| ~ 1e-3.
    h = jax.nn.gelu(h, approximate=True)
    y = jnp.dot(h.astype(jnp.bfloat16), _as_bf16(w2_ref[...]),
                preferred_element_type=jnp.float32)
    y = y + b2_ref[...].astype(jnp.float32) + r_ref[...].astype(jnp.float32)
    o_ref[...] = y.astype(o_ref.dtype)


def fused_mlp(x2d, gamma, beta, w1, b1, w2, b2, residual, eps=1e-5):
    M, D = x2d.shape
    D1, Hd = w1.shape
    assert D1 == D and w2.shape == (Hd, D)
    tm = _row_tile(M)
    grid = (pl.cdiv(M, tm),)
    kernel = functools.partial(_fused_mlp_kernel, eps=eps)
    return pl.pallas_call(
        kernel,
        out_shape=jax.ShapeDtypeStruct((M, D), x2d.dtype),
        grid=grid,
        in_specs=[
            pl.BlockSpec((tm, D), lambda i: (i, 0)),
            pl.BlockSpec((1, D), lambda i: (0, 0)),
            pl.BlockSpec((1, D), lambda i: (0, 0)),
            pl.BlockSpec((D, Hd), lambda i: (0, 0)),
            pl.BlockSpec((1, Hd), lambda i: (0, 0)),
            pl.BlockSpec((Hd, D), lambda i: (0, 0)),
            pl.BlockSpec((1, D), lambda i: (0, 0)),
            pl.BlockSpec((tm, D), lambda i: (i, 0)),
        ],
        out_specs=pl.BlockSpec((tm, D), lambda i: (i, 0)),
        compiler_params=pltpu.CompilerParams(
            dimension_semantics=("parallel",),
            vmem_limit_bytes=_VMEM_LIMIT),
    )(x2d, gamma.reshape(1, D), beta.reshape(1, D),
      w1, b1.reshape(1, Hd), w2, b2.reshape(1, D), residual)


# ----------------------------------------------------------------------------
# Attention + output projection + residual kernel.
# One batch element per grid step; per-head q/k/v sliced directly from the ref
# (no (S, 3D) f32 materialization); per-head attention output is immediately
# projected with the matching W_proj rows and accumulated into an f32 VMEM
# scratch (lane-dense D-wide result), then bias + residual added and stored
# once in (B, S, D) layout.  The 1/sqrt(Dh) scale is pre-folded into qkv_w.
# ----------------------------------------------------------------------------
def _attn_proj_kernel(qkv_ref, w_ref, b_ref, res_ref, o_ref, acc_ref, *,
                      num_heads):
    D = o_ref.shape[2]
    Dh = D // num_heads

    acc_ref[...] = (res_ref[0].astype(jnp.float32)
                    + b_ref[...].astype(jnp.float32))

    # TODO(synk): group heads so slice widths / contractions reach 128 lanes
    # (better fill on the 256-wide v6e/v7x MXU); per-head loop kept simple.
    for h in range(num_heads):                         # static head loop
        q = qkv_ref[0, :, pl.ds(h * Dh, Dh)]           # (S, Dh), scale folded
        k = qkv_ref[0, :, pl.ds(D + h * Dh, Dh)]
        v = qkv_ref[0, :, pl.ds(2 * D + h * Dh, Dh)]
        # contract last dims directly -> no explicit K transpose / VMEM copy
        s = jax.lax.dot_general(
            _as_bf16(q), _as_bf16(k),
            dimension_numbers=(((1,), (1,)), ((), ())),
            preferred_element_type=jnp.float32)        # (S, S) f32
        s = s - jnp.max(s, axis=-1, keepdims=True)
        p = jnp.exp(s)
        p = p * pl.reciprocal(jnp.sum(p, axis=-1, keepdims=True), approx=True)
        o_h = jnp.dot(_as_bf16(p), _as_bf16(v),
                      preferred_element_type=jnp.float32)       # (S, Dh)
        w_h = _as_bf16(w_ref[pl.ds(h * Dh, Dh), :])             # (Dh, D)
        acc_ref[...] += jnp.dot(_as_bf16(o_h), w_h,
                                preferred_element_type=jnp.float32)

    o_ref[0] = acc_ref[...].astype(o_ref.dtype)


def attention_proj(qkv, residual, proj_w, proj_b, *, num_heads):
    """qkv: (B, S, 3D) packed [Q|K|V]; residual: (B, S, D) -> (B, S, D).

    Computes residual + proj(softmax(QK^T)V) for all heads in one kernel.
    """
    B, S, threeD = qkv.shape
    D = threeD // 3
    # TODO(synk): for v7x megacore balance with small/odd B, add a query-tile
    # or head-group grid axis; grid=(B,) is enough at training batch sizes.
    kernel = functools.partial(_attn_proj_kernel, num_heads=num_heads)
    return pl.pallas_call(
        kernel,
        out_shape=jax.ShapeDtypeStruct((B, S, D), qkv.dtype),
        grid=(B,),
        in_specs=[pl.BlockSpec((1, S, threeD), lambda i: (i, 0, 0)),
                  pl.BlockSpec((D, D), lambda i: (0, 0)),
                  pl.BlockSpec((1, D), lambda i: (0, 0)),
                  pl.BlockSpec((1, S, D), lambda i: (i, 0, 0))],
        out_specs=pl.BlockSpec((1, S, D), lambda i: (i, 0, 0)),
        scratch_shapes=[pltpu.VMEM((S, D), jnp.float32)],
        compiler_params=pltpu.CompilerParams(
            dimension_semantics=("parallel",),
            vmem_limit_bytes=_VMEM_LIMIT),
    )(qkv, proj_w, proj_b.reshape(1, D), residual)


# ----------------------------------------------------------------------------
# Decoder parameters + forward
# ----------------------------------------------------------------------------
def init_decoder_params(key, *, img_size, patch_size, embed_dim, dec_embed_dim,
                        dec_num_layer, dec_num_heads, mlp_ratio):
    num_patches = (img_size // patch_size) ** 2
    hidden = int(dec_embed_dim * mlp_ratio)
    D = dec_embed_dim
    Dh = D // dec_num_heads
    scale = Dh ** -0.5

    def nrm(k, shape, std=0.02):
        return jax.random.normal(k, shape, jnp.float32) * std

    keys = iter(jax.random.split(key, 8 + 6 * dec_num_layer))

    params = {
        # matmul weights stored in bf16 (the MXU input dtype) -> halves HBM
        # traffic / VMEM residency; biases, LN params, embeddings stay f32.
        "dec_embed_w": nrm(next(keys), (embed_dim, D)).astype(jnp.bfloat16),
        "dec_embed_b": jnp.zeros((D,), jnp.float32),
        "dec_norm_g": jnp.ones((D,), jnp.float32),
        "dec_norm_b": jnp.zeros((D,), jnp.float32),
        "dec_proj_w": nrm(next(keys), (D, patch_size ** 2 * 3)).astype(jnp.bfloat16),
        "dec_proj_b": jnp.zeros((patch_size ** 2 * 3,), jnp.float32),
        "mask_token": nrm(next(keys), (1, 1, D)),
        "dec_pos_embed": jnp.asarray(
            get_2d_sincos_pos_embed(D, int(num_patches ** 0.5), cls_token=True),
            dtype=jnp.float32)[None],                       # (1, N+1, D)
    }
    blocks = []
    for _ in range(dec_num_layer):
        qkv_w = nrm(next(keys), (D, 3 * D))
        qkv_b = jnp.zeros((3 * D,), jnp.float32)
        # fold the 1/sqrt(Dh) attention scale into the Q columns once
        qkv_w = qkv_w.at[:, :D].multiply(scale)
        qkv_b = qkv_b.at[:D].multiply(scale)
        blocks.append({
            "norm1_g": jnp.ones((D,), jnp.float32),
            "norm1_b": jnp.zeros((D,), jnp.float32),
            "qkv_w": qkv_w.astype(jnp.bfloat16),
            "qkv_b": qkv_b,
            "proj_w": nrm(next(keys), (D, D)).astype(jnp.bfloat16),
            "proj_b": jnp.zeros((D,), jnp.float32),
            "norm2_g": jnp.ones((D,), jnp.float32),
            "norm2_b": jnp.zeros((D,), jnp.float32),
            "fc1_w": nrm(next(keys), (D, hidden)).astype(jnp.bfloat16),
            "fc1_b": jnp.zeros((hidden,), jnp.float32),
            "fc2_w": nrm(next(keys), (hidden, D)).astype(jnp.bfloat16),
            "fc2_b": jnp.zeros((D,), jnp.float32),
        })
    params["blocks"] = blocks
    return params


def decoder_forward(params, x, mask, ids_restore, *, num_heads):
    """x: (B, L, embed_dim); mask: (B, N) [unused, as in PyTorch];
       ids_restore: (B, N) int. Returns pred_patch: (B, N, patch_size**2*3)."""
    del mask
    B, L, E = x.shape
    D = params["dec_embed_w"].shape[1]
    H = num_heads                       # static Python int

    # dec_embed
    h = fused_linear(x.reshape(B * L, E),
                     params["dec_embed_w"], params["dec_embed_b"]).reshape(B, L, D)

    # TODO(synk): fuse this unshuffle gather + pos-embed add into the first
    # block's qkv projection via PrefetchScalarGridSpec; plain-JAX glue for now.
    N = ids_restore.shape[1]
    mask_tokens = jnp.broadcast_to(params["mask_token"], (B, N + 1 - L, D))
    x_ = jnp.concatenate([h[:, 1:, :], mask_tokens], axis=1)            # (B, N, D)
    x_ = jnp.take_along_axis(x_, ids_restore[:, :, None].astype(jnp.int32), axis=1)
    h = jnp.concatenate([h[:, :1, :], x_], axis=1)                      # (B, N+1, D)
    h = h + params["dec_pos_embed"]

    S = N + 1
    h2d = h.reshape(B * S, D)
    for blk in params["blocks"]:
        # --- attention sub-block: x = x + proj(attn(norm1(x))) ---
        qkv = fused_linear(h2d, blk["qkv_w"], blk["qkv_b"],
                           gamma=blk["norm1_g"], beta=blk["norm1_b"])   # (B*S, 3D)
        h2d = attention_proj(qkv.reshape(B, S, 3 * D),
                             h2d.reshape(B, S, D),
                             blk["proj_w"], blk["proj_b"],
                             num_heads=H).reshape(B * S, D)
        # --- MLP sub-block: x = x + fc2(gelu(fc1(norm2(x)))) (fully fused) ---
        h2d = fused_mlp(h2d, blk["norm2_g"], blk["norm2_b"],
                        blk["fc1_w"], blk["fc1_b"],
                        blk["fc2_w"], blk["fc2_b"], residual=h2d)

    # final norm + projection, lane-dense output (pad P to a multiple of 128)
    P = params["dec_proj_w"].shape[1]
    P_pad = ((P + 127) // 128) * 128
    w = params["dec_proj_w"]
    b = params["dec_proj_b"]
    if P_pad != P:
        w = jnp.pad(w, ((0, 0), (0, P_pad - P)))
        b = jnp.pad(b, (0, P_pad - P))
    out = fused_linear(h2d, w, b,
                       gamma=params["dec_norm_g"], beta=params["dec_norm_b"])
    out = out[:, :P].reshape(B, S, P)
    return out[:, 1:, :]    # drop cls token -> pred_patch


# ----------------------------------------------------------------------------
if __name__ == "__main__":
    # small config consistent with the module's constructor
    img_size, patch_size = 16, 4
    embed_dim, dec_embed_dim = 64, 32
    dec_num_layer, dec_num_heads, mlp_ratio = 2, 4, 4.0
    num_patches = (img_size // patch_size) ** 2          # 16
    B, num_kept = 2, 4
    L = num_kept + 1                                      # kept tokens + cls = 5

    key = jax.random.PRNGKey(0)
    k_param, k_x, k_perm = jax.random.split(key, 3)

    params = init_decoder_params(
        k_param, img_size=img_size, patch_size=patch_size, embed_dim=embed_dim,
        dec_embed_dim=dec_embed_dim, dec_num_layer=dec_num_layer,
        dec_num_heads=dec_num_heads, mlp_ratio=mlp_ratio)

    x = jax.random.normal(k_x, (B, L, embed_dim), jnp.float32)
    ids_restore = jnp.stack(
        [jax.random.permutation(k, num_patches)
         for k in jax.random.split(k_perm, B)]).astype(jnp.int32)        # (B, 16)
    mask = jnp.concatenate(
        [jnp.zeros((B, num_kept)), jnp.ones((B, num_patches - num_kept))],
        axis=1).astype(jnp.float32)                                      # (B, 16), unused

    decoder_fn = jax.jit(functools.partial(decoder_forward, num_heads=dec_num_heads))
    pred_patch = decoder_fn(params, x, mask, ids_restore)
    jax.block_until_ready(pred_patch)
    assert pred_patch.shape == (B, num_patches, patch_size ** 2 * 3)
    assert bool(jnp.all(jnp.isfinite(pred_patch)))
    print("KERNEL_OK")
</pallas_src>

<mosaic_0001>
module attributes {stable_mosaic.version = 11 : i64} {
  func.func @_fused_linear_kernel(%arg0: i32, %arg1: i32, %arg2: memref<10x64xf32, #tpu.memory_space<vmem>>, %arg3: memref<64x32xbf16, #tpu.memory_space<vmem>>, %arg4: memref<1x32xf32, #tpu.memory_space<vmem>>, %arg5: memref<10x32xf32, #tpu.memory_space<vmem>>, %arg6: memref<10x64xbf16, #tpu.memory_space<vmem>>) attributes {dimension_semantics = [#tpu.dimension_semantics<parallel>, #tpu.dimension_semantics<arbitrary>], iteration_bounds = array<i64: 1, 1>, scalar_prefetch = 0 : i64, scratch_operands = 1 : i64, tpu.core_type = #tpu.core_type<tc>, window_params = [{transform_indices = @transform_0, window_bounds = array<i64: 10, 64>}, {transform_indices = @transform_1, window_bounds = array<i64: 64, 32>}, {transform_indices = @transform_2, window_bounds = array<i64: 1, 32>}, {transform_indices = @transform_3, window_bounds = array<i64: 10, 32>}]} {
    %c0_i32 = arith.constant 0 : i32
    %0 = arith.cmpi eq, %arg1, %c0_i32 : i32
    %1 = arith.extui %0 : i1 to i32
    %c0_i32_0 = arith.constant 0 : i32
    %2 = arith.cmpi ne, %1, %c0_i32_0 : i32
    scf.if %2 {
      %c0_8 = arith.constant 0 : index
      %c0_9 = arith.constant 0 : index
      %10 = vector.load %arg2[%c0_8, %c0_9] : memref<10x64xf32, #tpu.memory_space<vmem>>, vector<10x64xf32>
      %11 = arith.truncf %10 : vector<10x64xf32> to vector<10x64xbf16>
      %c0_10 = arith.constant 0 : index
      %c0_11 = arith.constant 0 : index
      %12 = vector.load %arg6[%c0_10, %c0_11] : memref<10x64xbf16, #tpu.memory_space<vmem>>, vector<10x64xbf16>
      tpu.vector_store %arg6[%c0_10, %c0_11], %11 {strides = array<i32>} : memref<10x64xbf16, #tpu.memory_space<vmem>>, vector<10x64xbf16>,
    } else {
    }
    %c0 = arith.constant 0 : index
    %c0_1 = arith.constant 0 : index
    %3 = vector.load %arg6[%c0, %c0_1] : memref<10x64xbf16, #tpu.memory_space<vmem>>, vector<10x64xbf16>
    %c0_2 = arith.constant 0 : index
    %c0_3 = arith.constant 0 : index
    %4 = vector.load %arg3[%c0_2, %c0_3] : memref<64x32xbf16, #tpu.memory_space<vmem>>, vector<64x32xbf16>
    %cst = arith.constant dense<0.000000e+00> : vector<10x32xf32>
    %5 = tpu.matmul %3, %4, %cst {dimension_numbers = #tpu.dot_dimension_numbers<[1], [0], [0], [1], [0, 0, 1, 1], [], []>} : vector<10x64xbf16>, vector<64x32xbf16>, vector<10x32xf32> -> vector<10x32xf32>
    %c0_4 = arith.constant 0 : index
    %c0_5 = arith.constant 0 : index
    %6 = vector.load %arg4[%c0_4, %c0_5] : memref<1x32xf32, #tpu.memory_space<vmem>>, vector<1x32xf32>
    %7 = vector.broadcast %6 : vector<1x32xf32> to vector<10x32xf32>
    %8 = arith.addf %5, %7 : vector<10x32xf32>
    %c0_6 = arith.constant 0 : index
    %c0_7 = arith.constant 0 : index
    %9 = vector.load %arg5[%c0_6, %c0_7] : memref<10x32xf32, #tpu.memory_space<vmem>>, vector<10x32xf32>
    tpu.vector_store %arg5[%c0_6, %c0_7], %8 {strides = array<i32>} : memref<10x32xf32, #tpu.memory_space<vmem>>, vector<10x32xf32>,
    return
  }
  func.func @transform_0(%arg0: i32, %arg1: i32) -> (i32, i32) {
    %c0_i32 = arith.constant 0 : i32
    %c0_i32_0 = arith.constant 0 : i32
    return %arg0, %c0_i32 : i32, i32
  }
  func.func @transform_1(%arg0: i32, %arg1: i32) -> (i32, i32) {
    %c0_i32 = arith.constant 0 : i32
    %c0_i32_0 = arith.constant 0 : i32
    return %c0_i32, %arg1 : i32, i32
  }
  func.func @transform_2(%arg0: i32, %arg1: i32) -> (i32, i32) {
    %c0_i32 = arith.constant 0 : i32
    %c0_i32_0 = arith.constant 0 : i32
    return %c0_i32, %arg1 : i32, i32
  }
  func.func @transform_3(%arg0: i32, %arg1: i32) -> (i32, i32) {
    %c0_i32 = arith.constant 0 : i32
    return %arg0, %arg1 : i32, i32
  }
}

module attributes {stable_mosaic.version = 11 : i64} {
  func.func @_fused_linear_kernel(%arg0: i32, %arg1: i32, %arg2: memref<34x32xf32, #tpu.memory_space<vmem>>, %arg3: memref<1x32xf32, #tpu.memory_space<vmem>>, %arg4: memref<1x32xf32, #tpu.memory_space<vmem>>, %arg5: memref<32x96xbf16, #tpu.memory_space<vmem>>, %arg6: memref<1x96xf32, #tpu.memory_space<vmem>>, %arg7: memref<34x96xf32, #tpu.memory_space<vmem>>, %arg8: memref<34x32xbf16, #tpu.memory_space<vmem>>) attributes {dimension_semantics = [#tpu.dimension_semantics<parallel>, #tpu.dimension_semantics<arbitrary>], iteration_bounds = array<i64: 1, 1>, scalar_prefetch = 0 : i64, scratch_operands = 1 : i64, tpu.core_type = #tpu.core_type<tc>, window_params = [{transform_indices = @transform_0, window_bounds = array<i64: 34, 32>}, {pipeline_mode = #tpu.pipeline_mode<synchronous>, transform_indices = @transform_1, window_bounds = array<i64: 1, 32>}, {pipeline_mode = #tpu.pipeline_mode<synchronous>, transform_indices = @transform_2, window_bounds = array<i64: 1, 32>}, {transform_indices = @transform_3, window_bounds = array<i64: 32, 96>}, {transform_indices = @transform_4, window_bounds = array<i64: 1, 96>}, {transform_indices = @transform_5, window_bounds = array<i64: 34, 96>}]} {
    %c0_i32 = arith.constant 0 : i32
    %0 = arith.cmpi eq, %arg1, %c0_i32 : i32
    %1 = arith.extui %0 : i1 to i32
    %c0_i32_0 = arith.constant 0 : i32
    %2 = arith.cmpi ne, %1, %c0_i32_0 : i32
    scf.if %2 {
      %c0_8 = arith.constant 0 : index
      %c0_9 = arith.constant 0 : index
      %10 = vector.load %arg2[%c0_8, %c0_9] : memref<34x32xf32, #tpu.memory_space<vmem>>, vector<34x32xf32>
      %cst_10 = arith.constant dense<0.000000e+00> : vector<34xf32>
      %11 = vector.multi_reduction <add>, %10, %cst_10 [1] : vector<34x32xf32> to vector<34xf32>
      %12 = vector.shape_cast %11 : vector<34xf32> to vector<34x1xf32>
      %cst_11 = arith.constant 3.200000e+01 : f32
      %13 = vector.broadcast %cst_11 : f32 to vector<34x1xf32>
      %14 = arith.divf %12, %13 : vector<34x1xf32>
      %15 = vector.broadcast %14 : vector<34x1xf32> to vector<34x32xf32>
      %16 = arith.subf %10, %15 : vector<34x32xf32>
      %17 = arith.mulf %16, %16 : vector<34x32xf32>
      %cst_12 = arith.constant dense<0.000000e+00> : vector<34xf32>
      %18 = vector.multi_reduction <add>, %17, %cst_12 [1] : vector<34x32xf32> to vector<34xf32>
      %19 = vector.shape_cast %18 : vector<34xf32> to vector<34x1xf32>
      %cst_13 = arith.constant 3.200000e+01 : f32
      %20 = vector.broadcast %cst_13 : f32 to vector<34x1xf32>
      %21 = arith.divf %19, %20 : vector<34x1xf32>
      %22 = vector.broadcast %14 : vector<34x1xf32> to vector<34x32xf32>
      %23 = arith.subf %10, %22 : vector<34x32xf32>
      %cst_14 = arith.constant 9.99999974E-6 : f32
      %24 = vector.broadcast %cst_14 : f32 to vector<34x1xf32>
      %25 = arith.addf %21, %24 : vector<34x1xf32>
      %26 = math.rsqrt %25 : vector<34x1xf32>
      %27 = vector.broadcast %26 : vector<34x1xf32> to vector<34x32xf32>
      %28 = arith.mulf %23, %27 : vector<34x32xf32>
      %c0_15 = arith.constant 0 : index
      %c0_16 = arith.constant 0 : index
      %29 = vector.load %arg3[%c0_15, %c0_16] : memref<1x32xf32, #tpu.memory_space<vmem>>, vector<1x32xf32>
      %30 = vector.broadcast %29 : vector<1x32xf32> to vector<34x32xf32>
      %31 = arith.mulf %28, %30 : vector<34x32xf32>
      %c0_17 = arith.constant 0 : index
      %c0_18 = arith.constant 0 : index
      %32 = vector.load %arg4[%c0_17, %c0_18] : memref<1x32xf32, #tpu.memory_space<vmem>>, vector<1x32xf32>
      %33 = vector.broadcast %32 : vector<1x32xf32> to vector<34x32xf32>
      %34 = arith.addf %31, %33 : vector<34x32xf32>
      %35 = arith.truncf %34 : vector<34x32xf32> to vector<34x32xbf16>
      %c0_19 = arith.constant 0 : index
      %c0_20 = arith.constant 0 : index
      %36 = vector.load %arg8[%c0_19, %c0_20] : memref<34x32xbf16, #tpu.memory_space<vmem>>, vector<34x32xbf16>
      tpu.vector_store %arg8[%c0_19, %c0_20], %35 {strides = array<i32>} : memref<34x32xbf16, #tpu.memory_space<vmem>>, vector<34x32xbf16>,
    } else {
    }
    %c0 = arith.constant 0 : index
    %c0_1 = arith.constant 0 : index
    %3 = vector.load %arg8[%c0, %c0_1] : memref<34x32xbf16, #tpu.memory_space<vmem>>, vector<34x32xbf16>
    %c0_2 = arith.constant 0 : index
    %c0_3 = arith.constant 0 : index
    %4 = vector.load %arg5[%c0_2, %c0_3] : memref<32x96xbf16, #tpu.memory_space<vmem>>, vector<32x96xbf16>
    %cst = arith.constant dense<0.000000e+00> : vector<34x96xf32>
    %5 = tpu.matmul %3, %4, %cst {dimension_numbers = #tpu.dot_dimension_numbers<[1], [0], [0], [1], [0, 0, 1, 1], [], []>} : vector<34x32xbf16>, vector<32x96xbf16>, vector<34x96xf32> -> vector<34x96xf32>
    %c0_4 = arith.constant 0 : index
    %c0_5 = arith.constant 0 : index
    %6 = vector.load %arg6[%c0_4, %c0_5] : memref<1x96xf32, #tpu.memory_space<vmem>>, vector<1x96xf32>
    %7 = vector.broadcast %6 : vector<1x96xf32> to vector<34x96xf32>
    %8 = arith.addf %5, %7 : vector<34x96xf32>
    %c0_6 = arith.constant 0 : index
    %c0_7 = arith.constant 0 : index
    %9 = vector.load %arg7[%c0_6, %c0_7] : memref<34x96xf32, #tpu.memory_space<vmem>>, vector<34x96xf32>
    tpu.vector_store %arg7[%c0_6, %c0_7], %8 {strides = array<i32>} : memref<34x96xf32, #tpu.memory_space<vmem>>, vector<34x96xf32>,
    return
  }
  func.func @transform_0(%arg0: i32, %arg1: i32) -> (i32, i32) {
    %c0_i32 = arith.constant 0 : i32
    %c0_i32_0 = arith.constant 0 : i32
    return %arg0, %c0_i32 : i32, i32
  }
  func.func @transform_1(%arg0: i32, %arg1: i32) -> (i32, i32) {
    %c0_i32 = arith.constant 0 : i32
    %c0_i32_0 = arith.constant 0 : i32
    %c0_i32_1 = arith.constant 0 : i32
    return %c0_i32, %c0_i32_0 : i32, i32
  }
  func.func @transform_2(%arg0: i32, %arg1: i32) -> (i32, i32) {
    %c0_i32 = arith.constant 0 : i32
    %c0_i32_0 = arith.constant 0 : i32
    %c0_i32_1 = arith.constant 0 : i32
    return %c0_i32, %c0_i32_0 : i32, i32
  }
  func.func @transform_3(%arg0: i32, %arg1: i32) -> (i32, i32) {
    %c0_i32 = arith.constant 0 : i32
    %c0_i32_0 = arith.constant 0 : i32
    return %c0_i32, %arg1 : i32, i32
  }
  func.func @transform_4(%arg0: i32, %arg1: i32) -> (i32, i32) {
    %c0_i32 = arith.constant 0 : i32
    %c0_i32_0 = arith.constant 0 : i32
    return %c0_i32, %arg1 : i32, i32
  }
  func.func @transform_5(%arg0: i32, %arg1: i32) -> (i32, i32) {
    %c0_i32 = arith.constant 0 : i32
    return %arg0, %arg1 : i32, i32
  }
}

module attributes {stable_mosaic.version = 11 : i64} {
  func.func @_attn_proj_kernel(%arg0: i32, %arg1: memref<1x17x96xf32, #tpu.memory_space<vmem>>, %arg2: memref<32x32xbf16, #tpu.memory_space<vmem>>, %arg3: memref<1x32xf32, #tpu.memory_space<vmem>>, %arg4: memref<1x17x32xf32, #tpu.memory_space<vmem>>, %arg5: memref<1x17x32xf32, #tpu.memory_space<vmem>>, %arg6: memref<17x32xf32, #tpu.memory_space<vmem>>) attributes {dimension_semantics = [#tpu.dimension_semantics<parallel>], iteration_bounds = array<i64: 2>, scalar_prefetch = 0 : i64, scratch_operands = 1 : i64, tpu.core_type = #tpu.core_type<tc>, window_params = [{transform_indices = @transform_0, window_bounds = array<i64: 1, 17, 96>}, {pipeline_mode = #tpu.pipeline_mode<synchronous>, transform_indices = @transform_1, window_bounds = array<i64: 32, 32>}, {pipeline_mode = #tpu.pipeline_mode<synchronous>, transform_indices = @transform_2, window_bounds = array<i64: 1, 32>}, {transform_indices = @transform_3, window_bounds = array<i64: 1, 17, 32>}, {transform_indices = @transform_4, window_bounds = array<i64: 1, 17, 32>}]} {
    %c0 = arith.constant 0 : index
    %c0_0 = arith.constant 0 : index
    %c0_1 = arith.constant 0 : index
    %0 = vector.load %arg4[%c0, %c0_0, %c0_1] : memref<1x17x32xf32, #tpu.memory_space<vmem>>, vector<1x17x32xf32>
    %1 = vector.shape_cast %0 : vector<1x17x32xf32> to vector<17x32xf32>
    %c0_2 = arith.constant 0 : index
    %c0_3 = arith.constant 0 : index
    %2 = vector.load %arg3[%c0_2, %c0_3] : memref<1x32xf32, #tpu.memory_space<vmem>>, vector<1x32xf32>
    %3 = vector.broadcast %2 : vector<1x32xf32> to vector<17x32xf32>
    %4 = arith.addf %1, %3 : vector<17x32xf32>
    %c0_4 = arith.constant 0 : index
    %c0_5 = arith.constant 0 : index
    %5 = vector.load %arg6[%c0_4, %c0_5] : memref<17x32xf32, #tpu.memory_space<vmem>>, vector<17x32xf32>
    tpu.vector_store %arg6[%c0_4, %c0_5], %4 {strides = array<i32>} : memref<17x32xf32, #tpu.memory_space<vmem>>, vector<17x32xf32>,
    %c0_6 = arith.constant 0 : index
    %c0_7 = arith.constant 0 : index
    %c0_8 = arith.constant 0 : index
    %6 = vector.load %arg1[%c0_6, %c0_7, %c0_8] : memref<1x17x96xf32, #tpu.memory_space<vmem>>, vector<1x17x8xf32>
    %7 = vector.shape_cast %6 : vector<1x17x8xf32> to vector<17x8xf32>
    %c0_9 = arith.constant 0 : index
    %c0_10 = arith.constant 0 : index
    %c32 = arith.constant 32 : index
    %8 = vector.load %arg1[%c0_9, %c0_10, %c32] : memref<1x17x96xf32, #tpu.memory_space<vmem>>, vector<1x17x8xf32>
    %9 = vector.shape_cast %8 : vector<1x17x8xf32> to vector<17x8xf32>
    %c0_11 = arith.constant 0 : index
    %c0_12 = arith.constant 0 : index
    %c64 = arith.constant 64 : index
    %10 = vector.load %arg1[%c0_11, %c0_12, %c64] : memref<1x17x96xf32, #tpu.memory_space<vmem>>, vector<1x17x8xf32>
    %11 = vector.shape_cast %10 : vector<1x17x8xf32> to vector<17x8xf32>
    %12 = arith.truncf %7 : vector<17x8xf32> to vector<17x8xbf16>
    %13 = arith.truncf %9 : vector<17x8xf32> to vector<17x8xbf16>
    %cst = arith.constant dense<0.000000e+00> : vector<17x17xf32>
    %14 = tpu.matmul %12, %13, %cst {dimension_numbers = #tpu.dot_dimension_numbers<[1], [1], [0], [0], [0, 0, 1, 0], [], []>} : vector<17x8xbf16>, vector<17x8xbf16>, vector<17x17xf32> -> vector<17x17xf32>
    %cst_13 = arith.constant dense<0xFF800000> : vector<17xf32>
    %15 = vector.multi_reduction <maximumf>, %14, %cst_13 [1] : vector<17x17xf32> to vector<17xf32>
    %16 = vector.shape_cast %15 : vector<17xf32> to vector<17x1xf32>
    %17 = vector.broadcast %16 : vector<17x1xf32> to vector<17x17xf32>
    %18 = arith.subf %14, %17 : vector<17x17xf32>
    %19 = math.exp %18 : vector<17x17xf32>
    %cst_14 = arith.constant dense<0.000000e+00> : vector<17xf32>
    %20 = vector.multi_reduction <add>, %19, %cst_14 [1] : vector<17x17xf32> to vector<17xf32>
    %21 = vector.shape_cast %20 : vector<17xf32> to vector<17x1xf32>
    %22 = tpu.reciprocal %21 {approx = true} : vector<17x1xf32> -> vector<17x1xf32>
    %23 = vector.broadcast %22 : vector<17x1xf32> to vector<17x17xf32>
    %24 = arith.mulf %19, %23 : vector<17x17xf32>
    %25 = arith.truncf %24 : vector<17x17xf32> to vector<17x17xbf16>
    %26 = arith.truncf %11 : vector<17x8xf32> to vector<17x8xbf16>
    %cst_15 = arith.constant dense<0.000000e+00> : vector<17x8xf32>
    %27 = tpu.matmul %25, %26, %cst_15 {dimension_numbers = #tpu.dot_dimension_numbers<[1], [0], [0], [1], [0, 0, 1, 1], [], []>} : vector<17x17xbf16>, vector<17x8xbf16>, vector<17x8xf32> -> vector<17x8xf32>
    %c0_16 = arith.constant 0 : index
    %c0_17 = arith.constant 0 : index
    %28 = vector.load %arg2[%c0_16, %c0_17] : memref<32x32xbf16, #tpu.memory_space<vmem>>, vector<8x32xbf16>
    %c0_18 = arith.constant 0 : index
    %c0_19 = arith.constant 0 : index
    %29 = vector.load %arg6[%c0_18, %c0_19] : memref<17x32xf32, #tpu.memory_space<vmem>>, vector<17x32xf32>
    %30 = arith.truncf %27 : vector<17x8xf32> to vector<17x8xbf16>
    %cst_20 = arith.constant dense<0.000000e+00> : vector<17x32xf32>
    %31 = tpu.matmul %30, %28, %cst_20 {dimension_numbers = #tpu.dot_dimension_numbers<[1], [0], [0], [1], [0, 0, 1, 1], [], []>} : vector<17x8xbf16>, vector<8x32xbf16>, vector<17x32xf32> -> vector<17x32xf32>
    %32 = arith.addf %29, %31 : vector<17x32xf32>
    %c0_21 = arith.constant 0 : index
    %c0_22 = arith.constant 0 : index
    %33 = vector.load %arg6[%c0_21, %c0_22] : memref<17x32xf32, #tpu.memory_space<vmem>>, vector<17x32xf32>
    tpu.vector_store %arg6[%c0_21, %c0_22], %32 {strides = array<i32>} : memref<17x32xf32, #tpu.memory_space<vmem>>, vector<17x32xf32>,
    %c0_23 = arith.constant 0 : index
    %c0_24 = arith.constant 0 : index
    %c8 = arith.constant 8 : index
    %34 = vector.load %arg1[%c0_23, %c0_24, %c8] : memref<1x17x96xf32, #tpu.memory_space<vmem>>, vector<1x17x8xf32>
    %35 = vector.shape_cast %34 : vector<1x17x8xf32> to vector<17x8xf32>
    %c0_25 = arith.constant 0 : index
    %c0_26 = arith.constant 0 : index
    %c40 = arith.constant 40 : index
    %36 = vector.load %arg1[%c0_25, %c0_26, %c40] : memref<1x17x96xf32, #tpu.memory_space<vmem>>, vector<1x17x8xf32>
    %37 = vector.shape_cast %36 : vector<1x17x8xf32> to vector<17x8xf32>
    %c0_27 = arith.constant 0 : index
    %c0_28 = arith.constant 0 : index
    %c72 = arith.constant 72 : index
    %38 = vector.load %arg1[%c0_27, %c0_28, %c72] : memref<1x17x96xf32, #tpu.memory_space<vmem>>, vector<1x17x8xf32>
    %39 = vector.shape_cast %38 : vector<1x17x8xf32> to vector<17x8xf32>
    %40 = arith.truncf %35 : vector<17x8xf32> to vector<17x8xbf16>
    %41 = arith.truncf %37 : vector<17x8xf32> to vector<17x8xbf16>
    %cst_29 = arith.constant dense<0.000000e+00> : vector<17x17xf32>
    %42 = tpu.matmul %40, %41, %cst_29 {dimension_numbers = #tpu.dot_dimension_numbers<[1], [1], [0], [0], [0, 0, 1, 0], [], []>} : vector<17x8xbf16>, vector<17x8xbf16>, vector<17x17xf32> -> vector<17x17xf32>
    %cst_30 = arith.constant dense<0xFF800000> : vector<17xf32>
    %43 = vector.multi_reduction <maximumf>, %42, %cst_30 [1] : vector<17x17xf32> to vector<17xf32>
    %44 = vector.shape_cast %43 : vector<17xf32> to vector<17x1xf32>
    %45 = vector.broadcast %44 : vector<17x1xf32> to vector<17x17xf32>
    %46 = arith.subf %42, %45 : vector<17x17xf32>
    %47 = math.exp %46 : vector<17x17xf32>
    %cst_31 = arith.constant dense<0.000000e+00> : vector<17xf32>
    %48 = vector.multi_reduction <add>, %47, %cst_31 [1] : vector<17x17xf32> to vector<17xf32>
    %49 = vector.shape_cast %48 : vector<17xf32> to vector<17x1xf32>
    %50 = tpu.reciprocal %49 {approx = true} : vector<17x1xf32> -> vector<17x1xf32>
    %51 = vector.broadcast %50 : vector<17x1xf32> to vector<17x17xf32>
    %52 = arith.mulf %47, %51 : vector<17x17xf32>
    %53 = arith.truncf %52 : vector<17x17xf32> to vector<17x17xbf16>
    %54 = arith.truncf %39 : vector<17x8xf32> to vector<17x8xbf16>
    %cst_32 = arith.constant dense<0.000000e+00> : vector<17x8xf32>
    %55 = tpu.matmul %53, %54, %cst_32 {dimension_numbers = #tpu.dot_dimension_numbers<[1], [0], [0], [1], [0, 0, 1, 1], [], []>} : vector<17x17xbf16>, vector<17x8xbf16>, vector<17x8xf32> -> vector<17x8xf32>
    %c8_33 = arith.constant 8 : index
    %c0_34 = arith.constant 0 : index
    %56 = vector.load %arg2[%c8_33, %c0_34] : memref<32x32xbf16, #tpu.memory_space<vmem>>, vector<8x32xbf16>
    %c0_35 = arith.constant 0 : index
    %c0_36 = arith.constant 0 : index
    %57 = vector.load %arg6[%c0_35, %c0_36] : memref<17x32xf32, #tpu.memory_space<vmem>>, vector<17x32xf32>
    %58 = arith.truncf %55 : vector<17x8xf32> to vector<17x8xbf16>
    %cst_37 = arith.constant dense<0.000000e+00> : vector<17x32xf32>
    %59 = tpu.matmul %58, %56, %cst_37 {dimension_numbers = #tpu.dot_dimension_numbers<[1], [0], [0], [1], [0, 0, 1, 1], [], []>} : vector<17x8xbf16>, vector<8x32xbf16>, vector<17x32xf32> -> vector<17x32xf32>
    %60 = arith.addf %57, %59 : vector<17x32xf32>
    %c0_38 = arith.constant 0 : index
    %c0_39 = arith.constant 0 : index
    %61 = vector.load %arg6[%c0_38, %c0_39] : memref<17x32xf32, #tpu.memory_space<vmem>>, vector<17x32xf32>
    tpu.vector_store %arg6[%c0_38, %c0_39], %60 {strides = array<i32>} : memref<17x32xf32, #tpu.memory_space<vmem>>, vector<17x32xf32>,
    %c0_40 = arith.constant 0 : index
    %c0_41 = arith.constant 0 : index
    %c16 = arith.constant 16 : index
    %62 = vector.load %arg1[%c0_40, %c0_41, %c16] : memref<1x17x96xf32, #tpu.memory_space<vmem>>, vector<1x17x8xf32>
    %63 = vector.shape_cast %62 : vector<1x17x8xf32> to vector<17x8xf32>
    %c0_42 = arith.constant 0 : index
    %c0_43 = arith.constant 0 : index
    %c48 = arith.constant 48 : index
    %64 = vector.load %arg1[%c0_42, %c0_43, %c48] : memref<1x17x96xf32, #tpu.memory_space<vmem>>, vector<1x17x8xf32>
    %65 = vector.shape_cast %64 : vector<1x17x8xf32> to vector<17x8xf32>
    %c0_44 = arith.constant 0 : index
    %c0_45 = arith.constant 0 : index
    %c80 = arith.constant 80 : index
    %66 = vector.load %arg1[%c0_44, %c0_45, %c80] : memref<1x17x96xf32, #tpu.memory_space<vmem>>, vector<1x17x8xf32>
    %67 = vector.shape_cast %66 : vector<1x17x8xf32> to vector<17x8xf32>
    %68 = arith.truncf %63 : vector<17x8xf32> to vector<17x8xbf16>
    %69 = arith.truncf %65 : vector<17x8xf32> to vector<17x8xbf16>
    %cst_46 = arith.constant dense<0.000000e+00> : vector<17x17xf32>
    %70 = tpu.matmul %68, %69, %cst_46 {dimension_numbers = #tpu.dot_dimension_numbers<[1], [1], [0], [0], [0, 0, 1, 0], [], []>} : vector<17x8xbf16>, vector<17x8xbf16>, vector<17x17xf32> -> vector<17x17xf32>
    %cst_47 = arith.constant dense<0xFF800000> : vector<17xf32>
    %71 = vector.multi_reduction <maximumf>, %70, %cst_47 [1] : vector<17x17xf32> to vector<17xf32>
    %72 = vector.shape_cast %71 : vector<17xf32> to vector<17x1xf32>
    %73 = vector.broadcast %72 : vector<17x1xf32> to vector<17x17xf32>
    %74 = arith.subf %70, %73 : vector<17x17xf32>
    %75 = math.exp %74 : vector<17x17xf32>
    %cst_48 = arith.constant dense<0.000000e+00> : vector<17xf32>
    %76 = vector.multi_reduction <add>, %75, %cst_48 [1] : vector<17x17xf32> to vector<17xf32>
    %77 = vector.shape_cast %76 : vector<17xf32> to vector<17x1xf32>
    %78 = tpu.reciprocal %77 {approx = true} : vector<17x1xf32> -> vector<17x1xf32>
    %79 = vector.broadcast %78 : vector<17x1xf32> to vector<17x17xf32>
    %80 = arith.mulf %75, %79 : vector<17x17xf32>
    %81 = arith.truncf %80 : vector<17x17xf32> to vector<17x17xbf16>
    %82 = arith.truncf %67 : vector<17x8xf32> to vector<17x8xbf16>
    %cst_49 = arith.constant dense<0.000000e+00> : vector<17x8xf32>
    %83 = tpu.matmul %81, %82, %cst_49 {dimension_numbers = #tpu.dot_dimension_numbers<[1], [0], [0], [1], [0, 0, 1, 1], [], []>} : vector<17x17xbf16>, vector<17x8xbf16>, vector<17x8xf32> -> vector<17x8xf32>
    %c16_50 = arith.constant 16 : index
    %c0_51 = arith.constant 0 : index
    %84 = vector.load %arg2[%c16_50, %c0_51] : memref<32x32xbf16, #tpu.memory_space<vmem>>, vector<8x32xbf16>
    %c0_52 = arith.constant 0 : index
    %c0_53 = arith.constant 0 : index
    %85 = vector.load %arg6[%c0_52, %c0_53] : memref<17x32xf32, #tpu.memory_space<vmem>>, vector<17x32xf32>
    %86 = arith.truncf %83 : vector<17x8xf32> to vector<17x8xbf16>
    %cst_54 = arith.constant dense<0.000000e+00> : vector<17x32xf32>
    %87 = tpu.matmul %86, %84, %cst_54 {dimension_numbers = #tpu.dot_dimension_numbers<[1], [0], [0], [1], [0, 0, 1, 1], [], []>} : vector<17x8xbf16>, vector<8x32xbf16>, vector<17x32xf32> -> vector<17x32xf32>
    %88 = arith.addf %85, %87 : vector<17x32xf32>
    %c0_55 = arith.constant 0 : index
    %c0_56 = arith.constant 0 : index
    %89 = vector.load %arg6[%c0_55, %c0_56] : memref<17x32xf32, #tpu.memory_space<vmem>>, vector<17x32xf32>
    tpu.vector_store %arg6[%c0_55, %c0_56], %88 {strides = array<i32>} : memref<17x32xf32, #tpu.memory_space<vmem>>, vector<17x32xf32>,
    %c0_57 = arith.constant 0 : index
    %c0_58 = arith.constant 0 : index
    %c24 = arith.constant 24 : index
    %90 = vector.load %arg1[%c0_57, %c0_58, %c24] : memref<1x17x96xf32, #tpu.memory_space<vmem>>, vector<1x17x8xf32>
    %91 = vector.shape_cast %90 : vector<1x17x8xf32> to vector<17x8xf32>
    %c0_59 = arith.constant 0 : index
    %c0_60 = arith.constant 0 : index
    %c56 = arith.constant 56 : index
    %92 = vector.load %arg1[%c0_59, %c0_60, %c56] : memref<1x17x96xf32, #tpu.memory_space<vmem>>, vector<1x17x8xf32>
    %93 = vector.shape_cast %92 : vector<1x17x8xf32> to vector<17x8xf32>
    %c0_61 = arith.constant 0 : index
    %c0_62 = arith.constant 0 : index
    %c88 = arith.constant 88 : index
    %94 = vector.load %arg1[%c0_61, %c0_62, %c88] : memref<1x17x96xf32, #tpu.memory_space<vmem>>, vector<1x17x8xf32>
    %95 = vector.shape_cast %94 : vector<1x17x8xf32> to vector<17x8xf32>
    %96 = arith.truncf %91 : vector<17x8xf32> to vector<17x8xbf16>
    %97 = arith.truncf %93 : vector<17x8xf32> to vector<17x8xbf16>
    %cst_63 = arith.constant dense<0.000000e+00> : vector<17x17xf32>
    %98 = tpu.matmul %96, %97, %cst_63 {dimension_numbers = #tpu.dot_dimension_numbers<[1], [1], [0], [0], [0, 0, 1, 0], [], []>} : vector<17x8xbf16>, vector<17x8xbf16>, vector<17x17xf32> -> vector<17x17xf32>
    %cst_64 = arith.constant dense<0xFF800000> : vector<17xf32>
    %99 = vector.multi_reduction <maximumf>, %98, %cst_64 [1] : vector<17x17xf32> to vector<17xf32>
    %100 = vector.shape_cast %99 : vector<17xf32> to vector<17x1xf32>
    %101 = vector.broadcast %100 : vector<17x1xf32> to vector<17x17xf32>
    %102 = arith.subf %98, %101 : vector<17x17xf32>
    %103 = math.exp %102 : vector<17x17xf32>
    %cst_65 = arith.constant dense<0.000000e+00> : vector<17xf32>
    %104 = vector.multi_reduction <add>, %103, %cst_65 [1] : vector<17x17xf32> to vector<17xf32>
    %105 = vector.shape_cast %104 : vector<17xf32> to vector<17x1xf32>
    %106 = tpu.reciprocal %105 {approx = true} : vector<17x1xf32> -> vector<17x1xf32>
    %107 = vector.broadcast %106 : vector<17x1xf32> to vector<17x17xf32>
    %108 = arith.mulf %103, %107 : vector<17x17xf32>
    %109 = arith.truncf %108 : vector<17x17xf32> to vector<17x17xbf16>
    %110 = arith.truncf %95 : vector<17x8xf32> to vector<17x8xbf16>
    %cst_66 = arith.constant dense<0.000000e+00> : vector<17x8xf32>
    %111 = tpu.matmul %109, %110, %cst_66 {dimension_numbers = #tpu.dot_dimension_numbers<[1], [0], [0], [1], [0, 0, 1, 1], [], []>} : vector<17x17xbf16>, vector<17x8xbf16>, vector<17x8xf32> -> vector<17x8xf32>
    %c24_67 = arith.constant 24 : index
    %c0_68 = arith.constant 0 : index
    %112 = vector.load %arg2[%c24_67, %c0_68] : memref<32x32xbf16, #tpu.memory_space<vmem>>, vector<8x32xbf16>
    %c0_69 = arith.constant 0 : index
    %c0_70 = arith.constant 0 : index
    %113 = vector.load %arg6[%c0_69, %c0_70] : memref<17x32xf32, #tpu.memory_space<vmem>>, vector<17x32xf32>
    %114 = arith.truncf %111 : vector<17x8xf32> to vector<17x8xbf16>
    %cst_71 = arith.constant dense<0.000000e+00> : vector<17x32xf32>
    %115 = tpu.matmul %114, %112, %cst_71 {dimension_numbers = #tpu.dot_dimension_numbers<[1], [0], [0], [1], [0, 0, 1, 1], [], []>} : vector<17x8xbf16>, vector<8x32xbf16>, vector<17x32xf32> -> vector<17x32xf32>
    %116 = arith.addf %113, %115 : vector<17x32xf32>
    %c0_72 = arith.constant 0 : index
    %c0_73 = arith.constant 0 : index
    %117 = vector.load %arg6[%c0_72, %c0_73] : memref<17x32xf32, #tpu.memory_space<vmem>>, vector<17x32xf32>
    tpu.vector_store %arg6[%c0_72, %c0_73], %116 {strides = array<i32>} : memref<17x32xf32, #tpu.memory_space<vmem>>, vector<17x32xf32>,
    %c0_74 = arith.constant 0 : index
    %c0_75 = arith.constant 0 : index
    %118 = vector.load %arg6[%c0_74, %c0_75] : memref<17x32xf32, #tpu.memory_space<vmem>>, vector<17x32xf32>
    %c0_76 = arith.constant 0 : index
    %c0_77 = arith.constant 0 : index
    %c0_78 = arith.constant 0 : index
    %119 = vector.load %arg5[%c0_76, %c0_77, %c0_78] : memref<1x17x32xf32, #tpu.memory_space<vmem>>, vector<1x17x32xf32>
    %120 = vector.shape_cast %119 : vector<1x17x32xf32> to vector<17x32xf32>
    %121 = vector.shape_cast %118 : vector<17x32xf32> to vector<1x17x32xf32>
    tpu.vector_store %arg5[%c0_76, %c0_77, %c0_78], %121 {strides = array<i32>} : memref<1x17x32xf32, #tpu.memory_space<vmem>>, vector<1x17x32xf32>,
    return
  }
  func.func @transform_0(%arg0: i32) -> (i32, i32, i32) {
    %c0_i32 = arith.constant 0 : i32
    %c0_i32_0 = arith.constant 0 : i32
    %c0_i32_1 = arith.constant 0 : i32
    return %arg0, %c0_i32, %c0_i32_0 : i32, i32, i32
  }
  func.func @transform_1(%arg0: i32) -> (i32, i32) {
    %c0_i32 = arith.constant 0 : i32
    %c0_i32_0 = arith.constant 0 : i32
    %c0_i32_1 = arith.constant 0 : i32
    return %c0_i32, %c0_i32_0 : i32, i32
  }
  func.func @transform_2(%arg0: i32) -> (i32, i32) {
    %c0_i32 = arith.constant 0 : i32
    %c0_i32_0 = arith.constant 0 : i32
    %c0_i32_1 = arith.constant 0 : i32
    return %c0_i32, %c0_i32_0 : i32, i32
  }
  func.func @transform_3(%arg0: i32) -> (i32, i32, i32) {
    %c0_i32 = arith.constant 0 : i32
    %c0_i32_0 = arith.constant 0 : i32
    %c0_i32_1 = arith.constant 0 : i32
    return %arg0, %c0_i32, %c0_i32_0 : i32, i32, i32
  }
  func.func @transform_4(%arg0: i32) -> (i32, i32, i32) {
    %c0_i32 = arith.constant 0 : i32
    %c0_i32_0 = arith.constant 0 : i32
    %c0_i32_1 = arith.constant 0 : i32
    return %arg0, %c0_i32, %c0_i32_0 : i32, i32, i32
  }
}

module attributes {stable_mosaic.version = 11 : i64} {
  func.func @_fused_mlp_kernel(%arg0: i32, %arg1: memref<34x32xf32, #tpu.memory_space<vmem>>, %arg2: memref<1x32xf32, #tpu.memory_space<vmem>>, %arg3: memref<1x32xf32, #tpu.memory_space<vmem>>, %arg4: memref<32x128xbf16, #tpu.memory_space<vmem>>, %arg5: memref<1x128xf32, #tpu.memory_space<vmem>>, %arg6: memref<128x32xbf16, #tpu.memory_space<vmem>>, %arg7: memref<1x32xf32, #tpu.memory_space<vmem>>, %arg8: memref<34x32xf32, #tpu.memory_space<vmem>>, %arg9: memref<34x32xf32, #tpu.memory_space<vmem>>) attributes {dimension_semantics = [#tpu.dimension_semantics<parallel>], iteration_bounds = array<i64: 1>, scalar_prefetch = 0 : i64, scratch_operands = 0 : i64, tpu.core_type = #tpu.core_type<tc>, window_params = [{transform_indices = @transform_0, window_bounds = array<i64: 34, 32>}, {pipeline_mode = #tpu.pipeline_mode<synchronous>, transform_indices = @transform_1, window_bounds = array<i64: 1, 32>}, {pipeline_mode = #tpu.pipeline_mode<synchronous>, transform_indices = @transform_2, window_bounds = array<i64: 1, 32>}, {pipeline_mode = #tpu.pipeline_mode<synchronous>, transform_indices = @transform_3, window_bounds = array<i64: 32, 128>}, {pipeline_mode = #tpu.pipeline_mode<synchronous>, transform_indices = @transform_4, window_bounds = array<i64: 1, 128>}, {pipeline_mode = #tpu.pipeline_mode<synchronous>, transform_indices = @transform_5, window_bounds = array<i64: 128, 32>}, {pipeline_mode = #tpu.pipeline_mode<synchronous>, transform_indices = @transform_6, window_bounds = array<i64: 1, 32>}, {transform_indices = @transform_7, window_bounds = array<i64: 34, 32>}, {transform_indices = @transform_8, window_bounds = array<i64: 34, 32>}]} {
    %c0 = arith.constant 0 : index
    %c0_0 = arith.constant 0 : index
    %0 = vector.load %arg1[%c0, %c0_0] : memref<34x32xf32, #tpu.memory_space<vmem>>, vector<34x32xf32>
    %cst = arith.constant dense<0.000000e+00> : vector<34xf32>
    %1 = vector.multi_reduction <add>, %0, %cst [1] : vector<34x32xf32> to vector<34xf32>
    %2 = vector.shape_cast %1 : vector<34xf32> to vector<34x1xf32>
    %cst_1 = arith.constant 3.200000e+01 : f32
    %3 = vector.broadcast %cst_1 : f32 to vector<34x1xf32>
    %4 = arith.divf %2, %3 : vector<34x1xf32>
    %5 = vector.broadcast %4 : vector<34x1xf32> to vector<34x32xf32>
    %6 = arith.subf %0, %5 : vector<34x32xf32>
    %7 = arith.mulf %6, %6 : vector<34x32xf32>
    %cst_2 = arith.constant dense<0.000000e+00> : vector<34xf32>
    %8 = vector.multi_reduction <add>, %7, %cst_2 [1] : vector<34x32xf32> to vector<34xf32>
    %9 = vector.shape_cast %8 : vector<34xf32> to vector<34x1xf32>
    %cst_3 = arith.constant 3.200000e+01 : f32
    %10 = vector.broadcast %cst_3 : f32 to vector<34x1xf32>
    %11 = arith.divf %9, %10 : vector<34x1xf32>
    %12 = vector.broadcast %4 : vector<34x1xf32> to vector<34x32xf32>
    %13 = arith.subf %0, %12 : vector<34x32xf32>
    %cst_4 = arith.constant 9.99999974E-6 : f32
    %14 = vector.broadcast %cst_4 : f32 to vector<34x1xf32>
    %15 = arith.addf %11, %14 : vector<34x1xf32>
    %16 = math.rsqrt %15 : vector<34x1xf32>
    %17 = vector.broadcast %16 : vector<34x1xf32> to vector<34x32xf32>
    %18 = arith.mulf %13, %17 : vector<34x32xf32>
    %c0_5 = arith.constant 0 : index
    %c0_6 = arith.constant 0 : index
    %19 = vector.load %arg2[%c0_5, %c0_6] : memref<1x32xf32, #tpu.memory_space<vmem>>, vector<1x32xf32>
    %20 = vector.broadcast %19 : vector<1x32xf32> to vector<34x32xf32>
    %21 = arith.mulf %18, %20 : vector<34x32xf32>
    %c0_7 = arith.constant 0 : index
    %c0_8 = arith.constant 0 : index
    %22 = vector.load %arg3[%c0_7, %c0_8] : memref<1x32xf32, #tpu.memory_space<vmem>>, vector<1x32xf32>
    %23 = vector.broadcast %22 : vector<1x32xf32> to vector<34x32xf32>
    %24 = arith.addf %21, %23 : vector<34x32xf32>
    %25 = arith.truncf %24 : vector<34x32xf32> to vector<34x32xbf16>
    %c0_9 = arith.constant 0 : index
    %c0_10 = arith.constant 0 : index
    %26 = vector.load %arg4[%c0_9, %c0_10] : memref<32x128xbf16, #tpu.memory_space<vmem>>, vector<32x128xbf16>
    %cst_11 = arith.constant dense<0.000000e+00> : vector<34x128xf32>
    %27 = tpu.matmul %25, %26, %cst_11 {dimension_numbers = #tpu.dot_dimension_numbers<[1], [0], [0], [1], [0, 0, 1, 1], [], []>} : vector<34x32xbf16>, vector<32x128xbf16>, vector<34x128xf32> -> vector<34x128xf32>
    %c0_12 = arith.constant 0 : index
    %c0_13 = arith.constant 0 : index
    %28 = vector.load %arg5[%c0_12, %c0_13] : memref<1x128xf32, #tpu.memory_space<vmem>>, vector<1x128xf32>
    %29 = vector.broadcast %28 : vector<1x128xf32> to vector<34x128xf32>
    %30 = arith.addf %27, %29 : vector<34x128xf32>
    %31 = arith.mulf %30, %30 : vector<34x128xf32>
    %32 = arith.mulf %30, %31 : vector<34x128xf32>
    %cst_14 = arith.constant 4.471500e-02 : f32
    %33 = vector.broadcast %cst_14 : f32 to vector<34x128xf32>
    %34 = arith.mulf %33, %32 : vector<34x128xf32>
    %35 = arith.addf %30, %34 : vector<34x128xf32>
    %cst_15 = arith.constant 0.797884583 : f32
    %36 = vector.broadcast %cst_15 : f32 to vector<34x128xf32>
    %37 = arith.mulf %36, %35 : vector<34x128xf32>
    %38 = math.tanh %37 : vector<34x128xf32>
    %cst_16 = arith.constant 1.000000e+00 : f32
    %39 = vector.broadcast %cst_16 : f32 to vector<34x128xf32>
    %40 = arith.addf %39, %38 : vector<34x128xf32>
    %cst_17 = arith.constant 5.000000e-01 : f32
    %41 = vector.broadcast %cst_17 : f32 to vector<34x128xf32>
    %42 = arith.mulf %41, %40 : vector<34x128xf32>
    %43 = arith.mulf %30, %42 : vector<34x128xf32>
    %44 = arith.truncf %43 : vector<34x128xf32> to vector<34x128xbf16>
    %c0_18 = arith.constant 0 : index
    %c0_19 = arith.constant 0 : index
    %45 = vector.load %arg6[%c0_18, %c0_19] : memref<128x32xbf16, #tpu.memory_space<vmem>>, vector<128x32xbf16>
    %cst_20 = arith.constant dense<0.000000e+00> : vector<34x32xf32>
    %46 = tpu.matmul %44, %45, %cst_20 {dimension_numbers = #tpu.dot_dimension_numbers<[1], [0], [0], [1], [0, 0, 1, 1], [], []>} : vector<34x128xbf16>, vector<128x32xbf16>, vector<34x32xf32> -> vector<34x32xf32>
    %c0_21 = arith.constant 0 : index
    %c0_22 = arith.constant 0 : index
    %47 = vector.load %arg7[%c0_21, %c0_22] : memref<1x32xf32, #tpu.memory_space<vmem>>, vector<1x32xf32>
    %48 = vector.broadcast %47 : vector<1x32xf32> to vector<34x32xf32>
    %49 = arith.addf %46, %48 : vector<34x32xf32>
    %c0_23 = arith.constant 0 : index
    %c0_24 = arith.constant 0 : index
    %50 = vector.load %arg8[%c0_23, %c0_24] : memref<34x32xf32, #tpu.memory_space<vmem>>, vector<34x32xf32>
    %51 = arith.addf %49, %50 : vector<34x32xf32>
    %c0_25 = arith.constant 0 : index
    %c0_26 = arith.constant 0 : index
    %52 = vector.load %arg9[%c0_25, %c0_26] : memref<34x32xf32, #tpu.memory_space<vmem>>, vector<34x32xf32>
    tpu.vector_store %arg9[%c0_25, %c0_26], %51 {strides = array<i32>} : memref<34x32xf32, #tpu.memory_space<vmem>>, vector<34x32xf32>,
    return
  }
  func.func @transform_0(%arg0: i32) -> (i32, i32) {
    %c0_i32 = arith.constant 0 : i32
    %c0_i32_0 = arith.constant 0 : i32
    return %arg0, %c0_i32 : i32, i32
  }
  func.func @transform_1(%arg0: i32) -> (i32, i32) {
    %c0_i32 = arith.constant 0 : i32
    %c0_i32_0 = arith.constant 0 : i32
    %c0_i32_1 = arith.constant 0 : i32
    return %c0_i32, %c0_i32_0 : i32, i32
  }
  func.func @transform_2(%arg0: i32) -> (i32, i32) {
    %c0_i32 = arith.constant 0 : i32
    %c0_i32_0 = arith.constant 0 : i32
    %c0_i32_1 = arith.constant 0 : i32
    return %c0_i32, %c0_i32_0 : i32, i32
  }
  func.func @transform_3(%arg0: i32) -> (i32, i32) {
    %c0_i32 = arith.constant 0 : i32
    %c0_i32_0 = arith.constant 0 : i32
    %c0_i32_1 = arith.constant 0 : i32
    return %c0_i32, %c0_i32_0 : i32, i32
  }
  func.func @transform_4(%arg0: i32) -> (i32, i32) {
    %c0_i32 = arith.constant 0 : i32
    %c0_i32_0 = arith.constant 0 : i32
    %c0_i32_1 = arith.constant 0 : i32
    return %c0_i32, %c0_i32_0 : i32, i32
  }
  func.func @transform_5(%arg0: i32) -> (i32, i32) {
    %c0_i32 = arith.constant 0 : i32
    %c0_i32_0 = arith.constant 0 : i32
    %c0_i32_1 = arith.constant 0 : i32
    return %c0_i32, %c0_i32_0 : i32, i32
  }
  func.func @transform_6(%arg0: i32) -> (i32, i32) {
    %c0_i32 = arith.constant 0 : i32
    %c0_i32_0 = arith.constant 0 : i32
    %c0_i32_1 = arith.constant 0 : i32
    return %c0_i32, %c0_i32_0 : i32, i32
  }
  func.func @transform_7(%arg0: i32) -> (i32, i32) {
    %c0_i32 = arith.constant 0 : i32
    %c0_i32_0 = arith.constant 0 : i32
    return %arg0, %c0_i32 : i32, i32
  }
  func.func @transform_8(%arg0: i32) -> (i32, i32) {
    %c0_i32 = arith.constant 0 : i32
    %c0_i32_0 = arith.constant 0 : i32
    return %arg0, %c0_i32 : i32, i32
  }
}

module attributes {stable_mosaic.version = 11 : i64} {
  func.func @_fused_linear_kernel(%arg0: i32, %arg1: i32, %arg2: memref<34x32xf32, #tpu.memory_space<vmem>>, %arg3: memref<1x32xf32, #tpu.memory_space<vmem>>, %arg4: memref<1x32xf32, #tpu.memory_space<vmem>>, %arg5: memref<32x128xbf16, #tpu.memory_space<vmem>>, %arg6: memref<1x128xf32, #tpu.memory_space<vmem>>, %arg7: memref<34x128xf32, #tpu.memory_space<vmem>>, %arg8: memref<34x32xbf16, #tpu.memory_space<vmem>>) attributes {dimension_semantics = [#tpu.dimension_semantics<parallel>, #tpu.dimension_semantics<arbitrary>], iteration_bounds = array<i64: 1, 1>, scalar_prefetch = 0 : i64, scratch_operands = 1 : i64, tpu.core_type = #tpu.core_type<tc>, window_params = [{transform_indices = @transform_0, window_bounds = array<i64: 34, 32>}, {pipeline_mode = #tpu.pipeline_mode<synchronous>, transform_indices = @transform_1, window_bounds = array<i64: 1, 32>}, {pipeline_mode = #tpu.pipeline_mode<synchronous>, transform_indices = @transform_2, window_bounds = array<i64: 1, 32>}, {transform_indices = @transform_3, window_bounds = array<i64: 32, 128>}, {transform_indices = @transform_4, window_bounds = array<i64: 1, 128>}, {transform_indices = @transform_5, window_bounds = array<i64: 34, 128>}]} {
    %c0_i32 = arith.constant 0 : i32
    %0 = arith.cmpi eq, %arg1, %c0_i32 : i32
    %1 = arith.extui %0 : i1 to i32
    %c0_i32_0 = arith.constant 0 : i32
    %2 = arith.cmpi ne, %1, %c0_i32_0 : i32
    scf.if %2 {
      %c0_8 = arith.constant 0 : index
      %c0_9 = arith.constant 0 : index
      %10 = vector.load %arg2[%c0_8, %c0_9] : memref<34x32xf32, #tpu.memory_space<vmem>>, vector<34x32xf32>
      %cst_10 = arith.constant dense<0.000000e+00> : vector<34xf32>
      %11 = vector.multi_reduction <add>, %10, %cst_10 [1] : vector<34x32xf32> to vector<34xf32>
      %12 = vector.shape_cast %11 : vector<34xf32> to vector<34x1xf32>
      %cst_11 = arith.constant 3.200000e+01 : f32
      %13 = vector.broadcast %cst_11 : f32 to vector<34x1xf32>
      %14 = arith.divf %12, %13 : vector<34x1xf32>
      %15 = vector.broadcast %14 : vector<34x1xf32> to vector<34x32xf32>
      %16 = arith.subf %10, %15 : vector<34x32xf32>
      %17 = arith.mulf %16, %16 : vector<34x32xf32>
      %cst_12 = arith.constant dense<0.000000e+00> : vector<34xf32>
      %18 = vector.multi_reduction <add>, %17, %cst_12 [1] : vector<34x32xf32> to vector<34xf32>
      %19 = vector.shape_cast %18 : vector<34xf32> to vector<34x1xf32>
      %cst_13 = arith.constant 3.200000e+01 : f32
      %20 = vector.broadcast %cst_13 : f32 to vector<34x1xf32>
      %21 = arith.divf %19, %20 : vector<34x1xf32>
      %22 = vector.broadcast %14 : vector<34x1xf32> to vector<34x32xf32>
      %23 = arith.subf %10, %22 : vector<34x32xf32>
      %cst_14 = arith.constant 9.99999974E-6 : f32
      %24 = vector.broadcast %cst_14 : f32 to vector<34x1xf32>
      %25 = arith.addf %21, %24 : vector<34x1xf32>
      %26 = math.rsqrt %25 : vector<34x1xf32>
      %27 = vector.broadcast %26 : vector<34x1xf32> to vector<34x32xf32>
      %28 = arith.mulf %23, %27 : vector<34x32xf32>
      %c0_15 = arith.constant 0 : index
      %c0_16 = arith.constant 0 : index
      %29 = vector.load %arg3[%c0_15, %c0_16] : memref<1x32xf32, #tpu.memory_space<vmem>>, vector<1x32xf32>
      %30 = vector.broadcast %29 : vector<1x32xf32> to vector<34x32xf32>
      %31 = arith.mulf %28, %30 : vector<34x32xf32>
      %c0_17 = arith.constant 0 : index
      %c0_18 = arith.constant 0 : index
      %32 = vector.load %arg4[%c0_17, %c0_18] : memref<1x32xf32, #tpu.memory_space<vmem>>, vector<1x32xf32>
      %33 = vector.broadcast %32 : vector<1x32xf32> to vector<34x32xf32>
      %34 = arith.addf %31, %33 : vector<34x32xf32>
      %35 = arith.truncf %34 : vector<34x32xf32> to vector<34x32xbf16>
      %c0_19 = arith.constant 0 : index
      %c0_20 = arith.constant 0 : index
      %36 = vector.load %arg8[%c0_19, %c0_20] : memref<34x32xbf16, #tpu.memory_space<vmem>>, vector<34x32xbf16>
      tpu.vector_store %arg8[%c0_19, %c0_20], %35 {strides = array<i32>} : memref<34x32xbf16, #tpu.memory_space<vmem>>, vector<34x32xbf16>,
    } else {
    }
    %c0 = arith.constant 0 : index
    %c0_1 = arith.constant 0 : index
    %3 = vector.load %arg8[%c0, %c0_1] : memref<34x32xbf16, #tpu.memory_space<vmem>>, vector<34x32xbf16>
    %c0_2 = arith.constant 0 : index
    %c0_3 = arith.constant 0 : index
    %4 = vector.load %arg5[%c0_2, %c0_3] : memref<32x128xbf16, #tpu.memory_space<vmem>>, vector<32x128xbf16>
    %cst = arith.constant dense<0.000000e+00> : vector<34x128xf32>
    %5 = tpu.matmul %3, %4, %cst {dimension_numbers = #tpu.dot_dimension_numbers<[1], [0], [0], [1], [0, 0, 1, 1], [], []>} : vector<34x32xbf16>, vector<32x128xbf16>, vector<34x128xf32> -> vector<34x128xf32>
    %c0_4 = arith.constant 0 : index
    %c0_5 = arith.constant 0 : index
    %6 = vector.load %arg6[%c0_4, %c0_5] : memref<1x128xf32, #tpu.memory_space<vmem>>, vector<1x128xf32>
    %7 = vector.broadcast %6 : vector<1x128xf32> to vector<34x128xf32>
    %8 = arith.addf %5, %7 : vector<34x128xf32>
    %c0_6 = arith.constant 0 : index
    %c0_7 = arith.constant 0 : index
    %9 = vector.load %arg7[%c0_6, %c0_7] : memref<34x128xf32, #tpu.memory_space<vmem>>, vector<34x128xf32>
    tpu.vector_store %arg7[%c0_6, %c0_7], %8 {strides = array<i32>} : memref<34x128xf32, #tpu.memory_space<vmem>>, vector<34x128xf32>,
    return
  }
  func.func @transform_0(%arg0: i32, %arg1: i32) -> (i32, i32) {
    %c0_i32 = arith.constant 0 : i32
    %c0_i32_0 = arith.constant 0 : i32
    return %arg0, %c0_i32 : i32, i32
  }
  func.func @transform_1(%arg0: i32, %arg1: i32) -> (i32, i32) {
    %c0_i32 = arith.constant 0 : i32
    %c0_i32_0 = arith.constant 0 : i32
    %c0_i32_1 = arith.constant 0 : i32
    return %c0_i32, %c0_i32_0 : i32, i32
  }
  func.func @transform_2(%arg0: i32, %arg1: i32) -> (i32, i32) {
    %c0_i32 = arith.constant 0 : i32
    %c0_i32_0 = arith.constant 0 : i32
    %c0_i32_1 = arith.constant 0 : i32
    return %c0_i32, %c0_i32_0 : i32, i32
  }
  func.func @transform_3(%arg0: i32, %arg1: i32) -> (i32, i32) {
    %c0_i32 = arith.constant 0 : i32
    %c0_i32_0 = arith.constant 0 : i32
    return %c0_i32, %arg1 : i32, i32
  }
  func.func @transform_4(%arg0: i32, %arg1: i32) -> (i32, i32) {
    %c0_i32 = arith.constant 0 : i32
    %c0_i32_0 = arith.constant 0 : i32
    return %c0_i32, %arg1 : i32, i32
  }
  func.func @transform_5(%arg0: i32, %arg1: i32) -> (i32, i32) {
    %c0_i32 = arith.constant 0 : i32
    return %arg0, %arg1 : i32, i32
  }
}

</mosaic_0001>

<bundles_post_ra>
// kernel: decoder_forward.8
= control target key start
LH: loop header
LB: loop body
LE: loop exit
PB: predicated region body
PF: predicated region fallthrough
CT: control target
= control target key end

     0   :  { %vm23_vm0 = vcmask 519168   ;;  %vm25_vm1 = vcmask 516096   ;;  %vm70_vm2 = vcmask 523264   ;;  %vm88_vm3 = vcmask 261120   ;;  %s170_s1 = inlined_call_operand.vmem [shape: bf16[64,32], index: 1, kind: input, shape index: {}]   ;;  %s171_s0 = inlined_call_operand.vmem [shape: f32[10,64], index: 0, kind: input, shape index: {}]   ;;  %s172_s2 = inlined_call_operand.vmem [shape: f32[1,32], index: 2, kind: input, shape index: {}]   ;;  %s173_s3 = inlined_call_operand.vmem [shape: f32[10,32], index: 3, kind: output, shape index: {}]  }
   0x1   :  { %v121_v0 = vld [vmem:[%s170_s1 + $0x18] sm:$0xff]  ;;  %v19_v1 = vld [vmem:[%s171_s0] sm:$0xff]  ;;  %v20_v2 = vld [vmem:[%s171_s0 + $0x8] sm:$0x3]  ;;  %vm90_vm4 = vcmask 254976  }
   0x2   :  { %78 = vmatpush.bf16.msra.mxu0 %v121_v0  ;;  %v120_v3 = vld [vmem:[%s170_s1 + $0x10] sm:$0xff]  ;;  %v21_v4 = vpack.c.bf16 %v19_v1, %v19_v1  ;;  %v22_v5 = vpack.c.bf16 %v20_v2, %v20_v2  ;;  %v119_v6 = vld [vmem:[%s170_s1 + $0x8] sm:$0xff]  ;;  %v118_v7 = vld [vmem:[%s170_s1] sm:$0xff] }
   0x3   :  { %v122_v11 = vld [vmem:[%s172_s2] ss:$0 sm:$0xff] }
   0x4   :  { %24 = vst.msk [vmem:[#allocation2] sm:$0xf] %vm23_vm0, %v21_v4 }
   0x5   :  { %26 = vst.msk [vmem:[#allocation2 + $0x4] sm:$0x1] %vm25_vm1, %v22_v5 }
   0x6   :  { %79 = vmatpush.bf16.msra.mxu0 %v120_v3 }
   0xa   :  { %80 = vmatpush.bf16.msra.mxu0 %v119_v6 }
   0xb   :  { %v98_v8 = vld [vmem:[#allocation2] sm:$0xf] }
   0xc   :  { %v117_v9 = vld [vmem:[#allocation2] sm:$0x10] }
   0xd   :  { %v99_v10 = vor.u32 %v117_v9, %v98_v8 }
   0xe   :  { %81 = vmatpush.bf16.msra.mxu0 %v118_v7 }
  0x11   :  { %116 = vmatmul.msk.bf16.vlgmr.msra.gmra.mxu0 %vm70_vm2, %v99_v10 }
  0x8e   :  { %v83_v12 = vpop.f32.mrf.mxu0 }
  0x8f   :  { %v84_v13 = vadd.f32 %v122_v11, %v83_v12 }
  0x91   :  { %89 = vst.msk [vmem:[%s173_s3] sm:$0xff] %vm88_vm3, %v84_v13 }
  0x96   :  { %v85_v14 = vpop.f32.mrf.mxu0 }
  0x97   :  { %v86_v15 = vadd.f32 %v122_v11, %v85_v14 }
  0x99   :  { %91 = vst.msk [vmem:[%s173_s3 + $0x8] sm:$0x3] %vm90_vm4, %v86_v15 }

// kernel: decoder_forward.9
= control target key start
LH: loop header
LB: loop body
LE: loop exit
PB: predicated region body
PF: predicated region fallthrough
CT: control target
= control target key end

     0   :  { %vm43_vm0 = vcmask 254976   ;;  %vm30_vm1 = vcmask 261120   ;;  %v304_v10 = vmov 32.0   ;;  %vm177_vm12 = vcmask 253952   ;;  %s438_s0 = inlined_call_operand.vmem [shape: f32[34,32], index: 0, kind: input, shape index: {}]   ;;  %s439_s1 = inlined_call_operand.vmem [shape: f32[1,32], index: 1, kind: input, shape index: {}]   ;;  %s440_s2 = inlined_call_operand.vmem [shape: f32[1,32], index: 2, kind: input, shape index: {}]   ;;  %s441_s4 = inlined_call_operand.vmem [shape: f32[1,96], index: 4, kind: input, shape index: {}]   ;;  %s442_s3 = inlined_call_operand.vmem [shape: bf16[32,96], index: 3, kind: input, shape index: {}]   ;;  %s443_s5 = inlined_call_operand.vmem [shape: f32[34,96], index: 5, kind: output, shape index: {}]  }
   0x1   :  { %v29_v0 = vld [vmem:[%s438_s0 + $0x20] sm:$0x3]  ;;  %v26_v1 = vld [vmem:[%s438_s0 + $0x8] sm:$0xff]  ;;  %v28_v4 = vld [vmem:[%s438_s0 + $0x18] sm:$0xff]  ;;  %292 = vrcp.f32 %v304_v10  ;;  %vm172_vm13 = vcmask 257024  }
   0x2   :  { %v44_v2 = vsel %vm43_vm0, %v29_v0, 0.0  ;;  %v34_v3 = vsel %vm30_vm1, %v26_v1, 0.0  ;;  %v40_v5 = vsel %vm30_vm1, %v28_v4, 0.0  ;;  %v27_v6 = vld [vmem:[%s438_s0 + $0x10] sm:$0xff]  ;;  %v25_v7 = vld [vmem:[%s438_s0] sm:$0xff]  ;;  %v283_v48 = vld [vmem:[%s442_s3 + $0x8] sm:$0xff] }
   0x3   :  { %45 = vadd.xlane.f32.xlu0 %v44_v2  ;;  %35 = vadd.xlane.f32.xlu1 %v34_v3  ;;  %v37_v8 = vsel %vm30_vm1, %v27_v6, 0.0  ;;  %v31_v9 = vsel %vm30_vm1, %v25_v7, 0.0  ;;  %v282_v49 = vld [vmem:[%s442_s3] sm:$0xff] }
   0x4   :  { %41 = vadd.xlane.f32.xlu2 %v40_v5  ;;  %285 = vmatpush.bf16.msra.mxu2 %v283_v48 }
   0x5   :  { %233 = vmatpush.bf16.msra.mxu0 %v283_v48  ;;  %284 = vmatpush.bf16.msra.mxu1 %v283_v48 }
   0x7   :  { %v293_v11 = vpop.eup %292 }
   0x8   :  { %v48_v12 = vmul.f32 32.0, %v293_v11  ;;  %vm52_vm2 = vweird.f32 %v293_v11  ;;  %287 = vmatpush.bf16.msra.mxu2 %v282_v49 }
   0x9   :  { %234 = vmatpush.bf16.msra.mxu0 %v282_v49  ;;  %286 = vmatpush.bf16.msra.mxu1 %v282_v49 }
   0xa   :  { %v49_v13 = vsub.f32 1.0, %v48_v12 }
   0xb   :  { %38 = vadd.xlane.f32.xlu1 %v37_v8  ;;  %32 = vadd.xlane.f32.xlu0 %v31_v9  ;;  %v289_v9 = vld [vmem:[%s439_s1] ss:$0 sm:$0xff] }
   0xc   :  { %v50_v14 = vmul.f32 %v293_v11, %v49_v13 }
   0xe   :  { %v51_v15 = vadd.f32 %v293_v11, %v50_v14  ;;  %v290_v14 = vld [vmem:[%s440_s2] ss:$0 sm:$0xff] }
  0x10   :  { %v355_v16 = vsel %vm52_vm2, %v293_v11, %v51_v15 }
  0x76   :  { %v46_v17 = vpop.xlane.xlu0 %45  ;;  %v36_v18 = vpop.xlane.xlu1 %35 }
  0x77   :  { %v58_v19 = vmul.f32 %v355_v16, %v46_v17  ;;  %v55_v20 = vmul.f32 %v355_v16, %v36_v18  ;;  %v42_v25 = vpop.xlane.xlu2 %41 }
  0x78   :  { %v57_v32 = vmul.f32 %v355_v16, %v42_v25 }
  0x79   :  { %v359_v21 = vsub.f32 %v29_v0, %v58_v19  ;;  %v361_v22 = vsub.f32 %v26_v1, %v55_v20 }
  0x7a   :  { %v376_v35 = vsub.f32 %v28_v4, %v57_v32 }
  0x7b   :  { %v68_v23 = vmul.f32 %v359_v21, %v359_v21  ;;  %v65_v24 = vmul.f32 %v361_v22, %v361_v22 }
  0x7c   :  { %v67_v40 = vmul.f32 %v376_v35, %v376_v35 }
  0x7d   :  { %v81_v26 = vsel %vm43_vm0, %v68_v23, 0.0  ;;  %v72_v27 = vsel %vm30_vm1, %v65_v24, 0.0 }
  0x7e   :  { %82 = vadd.xlane.f32.xlu2 %v81_v26  ;;  %73 = vadd.xlane.f32.xlu1 %v72_v27  ;;  %v39_v28 = vpop.xlane.xlu1 %38  ;;  %v33_v29 = vpop.xlane.xlu0 %32  ;;  %v78_v41 = vsel %vm30_vm1, %v67_v40, 0.0 }
  0x7f   :  { %v56_v30 = vmul.f32 %v355_v16, %v39_v28  ;;  %v54_v31 = vmul.f32 %v355_v16, %v33_v29 }
  0x81   :  { %v372_v33 = vsub.f32 %v27_v6, %v56_v30  ;;  %v374_v34 = vsub.f32 %v25_v7, %v54_v31 }
  0x83   :  { %v66_v36 = vmul.f32 %v372_v33, %v372_v33  ;;  %v64_v37 = vmul.f32 %v374_v34, %v374_v34 }
  0x85   :  { %v75_v38 = vsel %vm30_vm1, %v66_v36, 0.0  ;;  %v69_v39 = vsel %vm30_vm1, %v64_v37, 0.0 }
  0x86   :  { %76 = vadd.xlane.f32.xlu2 %v75_v38  ;;  %70 = vadd.xlane.f32.xlu0 %v69_v39 }
  0x8e   :  { %79 = vadd.xlane.f32.xlu0 %v78_v41 }
  0xf1   :  { %v83_v42 = vpop.xlane.xlu2 %82  ;;  %v74_v43 = vpop.xlane.xlu1 %73 }
  0xf2   :  { %v88_v44 = vmul.f32 %v83_v42, %v355_v16  ;;  %v85_v45 = vmul.f32 %v74_v43, %v355_v16 }
  0xf4   :  { %v93_v46 = vadd.f32 1e-05, %v88_v44  ;;  %v90_v47 = vadd.f32 1e-05, %v85_v45 }
  0xf6   :  { %294 = vrsqrt.f32 %v93_v46  ;;  %vm110_vm4 = vweird.f32 %v90_v47  ;;  %vm140_vm6 = vweird.f32 %v93_v46 }
  0xf7   :  { %296 = vrsqrt.f32 %v90_v47 }
  0xf9   :  { %v77_v50 = vpop.xlane.xlu2 %76  ;;  %v71_v51 = vpop.xlane.xlu0 %70 }
  0xfa   :  { %v86_v52 = vmul.f32 %v77_v50, %v355_v16  ;;  %v84_v53 = vmul.f32 %v71_v51, %v355_v16 }
  0xfc   :  { %v295_v54 = vpop.eup %294  ;;  %v91_v55 = vadd.f32 1e-05, %v86_v52  ;;  %v89_v56 = vadd.f32 1e-05, %v84_v53 }
  0xfd   :  { %v297_v57 = vpop.eup %296  ;;  %v135_v58 = vmul.f32 %v295_v54, %v93_v46  ;;  %vm141_vm3 = vweird.f32 %v295_v54 }
  0xfe   :  { %v105_v59 = vmul.f32 %v297_v57, %v90_v47  ;;  %298 = vrsqrt.f32 %v91_v55  ;;  %vm111_vm5 = vweird.f32 %v297_v57  ;;  %vm142_vm7 = vmor %vm140_vm6, %vm141_vm3  ;;  %vm120_vm9 = vweird.f32 %v91_v55 }
  0xff   :  { %v136_v60 = vmul.f32 %v295_v54, %v135_v58  ;;  %300 = vrsqrt.f32 %v89_v56  ;;  %vm112_vm8 = vmor %vm110_vm4, %vm111_vm5  ;;  %vm100_vm15 = vweird.f32 %v89_v56  ;;  %vm250_vm5 = vcmask 785408  }
 0x100   :  { %v106_v61 = vmul.f32 %v297_v57, %v105_v59  ;;  %vm255_vm6 = vcmask 779264  }
 0x101   :  { %v137_v62 = vmul.f32 0.5, %v136_v60  ;;  %v80_v63 = vpop.xlane.xlu0 %79 }
 0x102   :  { %v107_v0 = vmul.f32 0.5, %v106_v61  ;;  %v87_v1 = vmul.f32 %v80_v63, %v355_v16 }
 0x103   :  { %v138_v2 = vsub.f32 1.5, %v137_v62 }
 0x104   :  { %v299_v3 = vpop.eup %298  ;;  %v108_v4 = vsub.f32 1.5, %v107_v0  ;;  %v92_v5 = vadd.f32 1e-05, %v87_v1 }
 0x105   :  { %v301_v6 = vpop.eup %300  ;;  %v139_v7 = vmul.f32 %v295_v54, %v138_v2  ;;  %v115_v8 = vmul.f32 %v299_v3, %v91_v55  ;;  %vm121_vm10 = vweird.f32 %v299_v3 }
 0x106   :  { %v109_v10 = vmul.f32 %v297_v57, %v108_v4  ;;  %v95_v11 = vmul.f32 %v301_v6, %v89_v56  ;;  %302 = vrsqrt.f32 %v92_v5  ;;  %vm101_vm11 = vweird.f32 %v301_v6  ;;  %vm122_vm14 = vmor %vm120_vm9, %vm121_vm10 }
 0x107   :  { %v143_v12 = vsel %vm142_vm7, %v295_v54, %v139_v7  ;;  %v116_v13 = vmul.f32 %v299_v3, %v115_v8  ;;  %vm102_vm0 = vmor %vm100_vm15, %vm101_vm11  ;;  %vm130_vm3 = vweird.f32 %v92_v5 }
 0x108   :  { %v148_v15 = vmul.f32 %v143_v12, %v359_v21  ;;  %v113_v16 = vsel %vm112_vm8, %v297_v57, %v109_v10  ;;  %v96_v17 = vmul.f32 %v301_v6, %v95_v11 }
 0x109   :  { %v145_v18 = vmul.f32 %v113_v16, %v361_v22  ;;  %v117_v19 = vmul.f32 0.5, %v116_v13 }
 0x10a   :  { %v157_v20 = vmul.f32 %v289_v9, %v148_v15  ;;  %v97_v23 = vmul.f32 0.5, %v96_v17 }
 0x10b   :  { %v154_v24 = vmul.f32 %v289_v9, %v145_v18  ;;  %v118_v25 = vsub.f32 1.5, %v117_v19 }
 0x10c   :  { %v303_v26 = vpop.eup %302  ;;  %v166_v27 = vadd.f32 %v290_v14, %v157_v20  ;;  %v98_v28 = vsub.f32 1.5, %v97_v23 }
 0x10d   :  { %v163_v29 = vadd.f32 %v290_v14, %v154_v24  ;;  %v119_v30 = vmul.f32 %v299_v3, %v118_v25  ;;  %v125_v31 = vmul.f32 %v303_v26, %v92_v5  ;;  %vm131_vm2 = vweird.f32 %v303_v26 }
 0x10e   :  { %v171_v21 = vpack.c.bf16 %v166_v27, %v166_v27  ;;  %v99_v32 = vmul.f32 %v301_v6, %v98_v28  ;;  %vm132_vm4 = vmor %vm130_vm3, %vm131_vm2 }
 0x10f   :  { %v168_v22 = vpack.c.bf16 %v163_v29, %v163_v29  ;;  %v123_v36 = vsel %vm122_vm14, %v299_v3, %v119_v30  ;;  %v126_v37 = vmul.f32 %v303_v26, %v125_v31 }
 0x110   :  { %178 = vst.msk [vmem:[#allocation2 + $0x10] sm:$0x1] %vm177_vm12, %v171_v21  ;;  %v146_v38 = vmul.f32 %v123_v36, %v372_v33  ;;  %v103_v39 = vsel %vm102_vm0, %v301_v6, %v99_v32 }
 0x111   :  { %174 = vst.msk [vmem:[#allocation2 + $0x4] sm:$0xf] %vm172_vm13, %v168_v22  ;;  %v144_v40 = vmul.f32 %v103_v39, %v374_v34  ;;  %v127_v41 = vmul.f32 0.5, %v126_v37 }
 0x112   :  { %v155_v42 = vmul.f32 %v289_v9, %v146_v38 }
 0x113   :  { %v153_v43 = vmul.f32 %v289_v9, %v144_v40  ;;  %v128_v44 = vsub.f32 1.5, %v127_v41 }
 0x114   :  { %v164_v45 = vadd.f32 %v290_v14, %v155_v42 }
 0x115   :  { %v162_v46 = vadd.f32 %v290_v14, %v153_v43  ;;  %v129_v47 = vmul.f32 %v303_v26, %v128_v44 }
 0x116   :  { %v169_v48 = vpack.c.bf16 %v164_v45, %v164_v45 }
 0x117   :  { %v167_v49 = vpack.c.bf16 %v162_v46, %v162_v46  ;;  %v133_v50 = vsel %vm132_vm4, %v303_v26, %v129_v47  ;;  %v183_v51 = vld [vmem:[#allocation2 + $0x10] sm:$0x1] }
 0x118   :  { %175 = vst.msk [vmem:[#allocation2 + $0x8] sm:$0xf] %vm172_vm13, %v169_v48  ;;  %v147_v33 = vmul.f32 %v133_v50, %v376_v35  ;;  %v201_v52 = vunpack.c.l.b16 %v183_v51  ;;  %v291_v35 = vld [vmem:[%s441_s4] ss:$0 sm:$0xff] }
 0x119   :  { %173 = vst.msk [vmem:[#allocation2] sm:$0xf] %vm172_vm13, %v167_v49 }
 0x11a   :  { %v156_v34 = vmul.f32 %v289_v9, %v147_v33  ;;  %v204_v53 = vpack.c.b16 %v201_v52, %v201_v52 }
 0x11c   :  { %v165_v54 = vadd.f32 %v290_v14, %v156_v34  ;;  %279 = vmatmul.msk.bf16.vlgmr.msra.gmra.mxu2 %vm30_vm1, %v204_v53 }
 0x11e   :  { %v170_v55 = vpack.c.bf16 %v165_v54, %v165_v54 }
 0x120   :  { %176 = vst.msk [vmem:[#allocation2 + $0xc] sm:$0xf] %vm172_vm13, %v170_v55  ;;  %v280_v56 = vld [vmem:[#allocation2] sm:$0xff] }
 0x121   :  { %277 = vmatmul.msk.bf16.vlgmr.msra.gmra.mxu0 %vm30_vm1, %v280_v56 }
 0x127   :  { %v281_v57 = vld [vmem:[#allocation2 + $0x8] sm:$0xff] }
 0x128   :  { %278 = vmatmul.msk.bf16.vlgmr.msra.gmra.mxu1 %vm30_vm1, %v281_v57 }
 0x19e   :  { %v236_v58 = vpop.f32.mrf.mxu0 }
 0x19f   :  { %v246_v59 = vpop.f32.mrf.mxu2  ;;  %v237_v60 = vadd.f32 %v291_v35, %v236_v58 }
 0x1a0   :  { %v247_v61 = vadd.f32 %v291_v35, %v246_v59 }
 0x1a1   :  { %251 = vst.msk [vmem:[%s443_s5] sm:$0xff] %vm250_vm5, %v237_v60 }
 0x1a2   :  { %256 = vst.msk [vmem:[%s443_s5 + $0x20] sm:$0x3] %vm255_vm6, %v247_v61 }
 0x1a5   :  { %v241_v62 = vpop.f32.mrf.mxu1 }
 0x1a6   :  { %v238_v63 = vpop.f32.mrf.mxu0  ;;  %v242_v0 = vadd.f32 %v291_v35, %v241_v62 }
 0x1a7   :  { %v248_v1 = vpop.f32.mrf.mxu2  ;;  %v239_v2 = vadd.f32 %v291_v35, %v238_v63 }
 0x1a8   :  { %253 = vst.msk [vmem:[%s443_s5 + $0x10] sm:$0xff] %vm250_vm5, %v242_v0 }
 0x1a9   :  { %252 = vst.msk [vmem:[%s443_s5 + $0x8] sm:$0xff] %vm250_vm5, %v239_v2 }
 0x1ad   :  { %v243_v3 = vpop.f32.mrf.mxu1 }
 0x1ae   :  { %v244_v4 = vadd.f32 %v291_v35, %v243_v3 }
 0x1b0   :  { %254 = vst.msk [vmem:[%s443_s5 + $0x18] sm:$0xff] %vm250_vm5, %v244_v4 }

// kernel: decoder_forward.11
= control target key start
LH: loop header
LB: loop body
LE: loop exit
PB: predicated region body
PF: predicated region fallthrough
CT: control target
= control target key end

     0   :  { %vm35_vm0 = vcmask 261120   ;;  %vm48_vm1 = vcmask 254976   ;;  %v481_v10 = vmov 32.0   ;;  %s657_s0 = inlined_call_operand.vmem [shape: f32[34,32], index: 0, kind: input, shape index: {}, may-alias: {0,7}]   ;;  %s658_s1 = inlined_call_operand.vmem [shape: f32[1,32], index: 1, kind: input, shape index: {}]   ;;  %s659_s2 = inlined_call_operand.vmem [shape: f32[1,32], index: 2, kind: input, shape index: {}]   ;;  %s660_s4 = inlined_call_operand.vmem [shape: f32[1,128], index: 4, kind: input, shape index: {}]   ;;  %s661_s3 = inlined_call_operand.vmem [shape: bf16[32,128], index: 3, kind: input, shape index: {}]   ;;  %s662_s6 = inlined_call_operand.vmem [shape: f32[1,32], index: 6, kind: input, shape index: {}]   ;;  %s663_s5 = inlined_call_operand.vmem [shape: bf16[128,32], index: 5, kind: input, shape index: {}]   ;;  %s664_s7 = inlined_call_operand.vmem [shape: f32[34,32], index: 7, kind: input, shape index: {}, may-alias: {0,7}]   ;;  %s665_s8 = inlined_call_operand.vmem [shape: f32[34,32], index: 8, kind: output, shape index: {}]  }
   0x1   :  { %v32_v0 = vld [vmem:[%s657_s0 + $0x10] sm:$0xff]  ;;  %v30_v1 = vld [vmem:[%s657_s0] sm:$0xff]  ;;  %v33_v6 = vld [vmem:[%s657_s0 + $0x18] sm:$0xff]  ;;  %459 = vrcp.f32 %v481_v10 }
   0x2   :  { %v42_v2 = vsel %vm35_vm0, %v32_v0, 0.0  ;;  %v36_v3 = vsel %vm35_vm0, %v30_v1, 0.0  ;;  %v34_v4 = vld [vmem:[%s657_s0 + $0x20] sm:$0x3]  ;;  %v31_v7 = vld [vmem:[%s657_s0 + $0x8] sm:$0xff]  ;;  %v45_v8 = vsel %vm35_vm0, %v33_v6, 0.0 }
   0x3   :  { %43 = vadd.xlane.f32.xlu1 %v42_v2  ;;  %37 = vadd.xlane.f32.xlu0 %v36_v3  ;;  %v49_v5 = vsel %vm48_vm1, %v34_v4, 0.0  ;;  %v39_v9 = vsel %vm35_vm0, %v31_v7, 0.0  ;;  %v429_v42 = vld [vmem:[%s661_s3 + $0x8] sm:$0xff]  ;;  %v428_v47 = vld [vmem:[%s661_s3] sm:$0xff] }
   0x4   :  { %50 = vadd.xlane.f32.xlu2 %v49_v5  ;;  %210 = vmatpush.bf16.msra.mxu0 %v429_v42 }
   0x7   :  { %v460_v11 = vpop.eup %459 }
   0x8   :  { %v53_v12 = vmul.f32 32.0, %v460_v11  ;;  %vm57_vm2 = vweird.f32 %v460_v11  ;;  %211 = vmatpush.bf16.msra.mxu0 %v428_v47 }
   0xa   :  { %v54_v13 = vsub.f32 1.0, %v53_v12 }
   0xb   :  { %46 = vadd.xlane.f32.xlu1 %v45_v8  ;;  %40 = vadd.xlane.f32.xlu0 %v39_v9 }
   0xc   :  { %v55_v14 = vmul.f32 %v460_v11, %v54_v13 }
   0xe   :  { %v56_v15 = vadd.f32 %v460_v11, %v55_v14 }
  0x10   :  { %v58_v16 = vsel %vm57_vm2, %v460_v11, %v56_v15  ;;  %v455_v15 = vld [vmem:[%s658_s1] ss:$0 sm:$0xff] }
  0x76   :  { %v44_v17 = vpop.xlane.xlu1 %43  ;;  %v38_v18 = vpop.xlane.xlu0 %37 }
  0x77   :  { %v61_v19 = vmul.f32 %v58_v16, %v44_v17  ;;  %v59_v20 = vmul.f32 %v58_v16, %v38_v18  ;;  %v51_v25 = vpop.xlane.xlu2 %50 }
  0x78   :  { %v63_v32 = vmul.f32 %v58_v16, %v51_v25  ;;  %v456_v25 = vld [vmem:[%s659_s2] ss:$0 sm:$0xff] }
  0x79   :  { %v547_v21 = vsub.f32 %v32_v0, %v61_v19  ;;  %v549_v22 = vsub.f32 %v30_v1, %v59_v20 }
  0x7a   :  { %v561_v35 = vsub.f32 %v34_v4, %v63_v32 }
  0x7b   :  { %v71_v23 = vmul.f32 %v547_v21, %v547_v21  ;;  %v69_v24 = vmul.f32 %v549_v22, %v549_v22 }
  0x7c   :  { %v73_v40 = vmul.f32 %v561_v35, %v561_v35 }
  0x7d   :  { %v80_v26 = vsel %vm35_vm0, %v71_v23, 0.0  ;;  %v74_v27 = vsel %vm35_vm0, %v69_v24, 0.0 }
  0x7e   :  { %81 = vadd.xlane.f32.xlu1 %v80_v26  ;;  %v47_v28 = vpop.xlane.xlu1 %46  ;;  %75 = vadd.xlane.f32.xlu2 %v74_v27  ;;  %v41_v29 = vpop.xlane.xlu0 %40  ;;  %v86_v41 = vsel %vm48_vm1, %v73_v40, 0.0 }
  0x7f   :  { %v62_v30 = vmul.f32 %v58_v16, %v47_v28  ;;  %v60_v31 = vmul.f32 %v58_v16, %v41_v29 }
  0x81   :  { %v557_v33 = vsub.f32 %v33_v6, %v62_v30  ;;  %v559_v34 = vsub.f32 %v31_v7, %v60_v31 }
  0x83   :  { %v72_v36 = vmul.f32 %v557_v33, %v557_v33  ;;  %v70_v37 = vmul.f32 %v559_v34, %v559_v34 }
  0x85   :  { %v83_v38 = vsel %vm35_vm0, %v72_v36, 0.0  ;;  %v77_v39 = vsel %vm35_vm0, %v70_v37, 0.0 }
  0x86   :  { %84 = vadd.xlane.f32.xlu2 %v83_v38  ;;  %78 = vadd.xlane.f32.xlu0 %v77_v39 }
  0x8e   :  { %87 = vadd.xlane.f32.xlu0 %v86_v41 }
  0xf1   :  { %v76_v43 = vpop.xlane.xlu2 %75  ;;  %v82_v44 = vpop.xlane.xlu1 %81 }
  0xf2   :  { %v89_v45 = vmul.f32 %v76_v43, %v58_v16  ;;  %v91_v48 = vmul.f32 %v82_v44, %v58_v16 }
  0xf4   :  { %v94_v46 = vadd.f32 1e-05, %v89_v45  ;;  %v96_v49 = vadd.f32 1e-05, %v91_v48 }
  0xf6   :  { %461 = vrsqrt.f32 %v94_v46  ;;  %vm105_vm4 = vweird.f32 %v94_v46  ;;  %vm125_vm11 = vweird.f32 %v96_v49 }
  0xf7   :  { %463 = vrsqrt.f32 %v96_v49 }
  0xf9   :  { %v85_v50 = vpop.xlane.xlu2 %84  ;;  %v79_v51 = vpop.xlane.xlu0 %78 }
  0xfa   :  { %v92_v52 = vmul.f32 %v85_v50, %v58_v16  ;;  %v90_v53 = vmul.f32 %v79_v51, %v58_v16 }
  0xfc   :  { %v97_v54 = vadd.f32 1e-05, %v92_v52  ;;  %v95_v55 = vadd.f32 1e-05, %v90_v53  ;;  %v462_v56 = vpop.eup %461  ;;  %v436_v52 = vld [vmem:[%s663_s5 + $0x30] sm:$0xff]  ;;  %v434_v53 = vld [vmem:[%s663_s5 + $0x20] sm:$0xff] }
  0xfd   :  { %v100_v57 = vmul.f32 %v462_v56, %v94_v46  ;;  %v464_v61 = vpop.eup %463  ;;  %vm106_vm3 = vweird.f32 %v462_v56 }
  0xfe   :  { %465 = vrsqrt.f32 %v97_v54  ;;  %v120_v3 = vmul.f32 %v464_v61, %v96_v49  ;;  %vm107_vm5 = vmor %vm105_vm4, %vm106_vm3  ;;  %vm115_vm7 = vweird.f32 %v95_v55  ;;  %vm135_vm9 = vweird.f32 %v97_v54 }
  0xff   :  { %467 = vrsqrt.f32 %v95_v55  ;;  %v101_v58 = vmul.f32 %v462_v56, %v100_v57  ;;  %vm126_vm12 = vweird.f32 %v464_v61  ;;  %v457_v57 = vld [vmem:[%s660_s4] ss:$0 sm:$0xff] }
 0x100   :  { %v121_v9 = vmul.f32 %v464_v61, %v120_v3  ;;  %vm127_vm14 = vmor %vm125_vm11, %vm126_vm12 }
 0x101   :  { %v88_v59 = vpop.xlane.xlu0 %87  ;;  %v102_v60 = vmul.f32 0.5, %v101_v58  ;;  %v430_v58 = vld [vmem:[%s663_s5] sm:$0xff] }
 0x102   :  { %v93_v62 = vmul.f32 %v88_v59, %v58_v16  ;;  %v122_v16 = vmul.f32 0.5, %v121_v9 }
 0x103   :  { %v103_v0 = vsub.f32 1.5, %v102_v60 }
 0x104   :  { %v466_v63 = vpop.eup %465  ;;  %v98_v6 = vadd.f32 1e-05, %v93_v62  ;;  %v123_v26 = vsub.f32 1.5, %v122_v16 }
 0x105   :  { %v468_v1 = vpop.eup %467  ;;  %v130_v2 = vmul.f32 %v466_v63, %v97_v54  ;;  %v104_v4 = vmul.f32 %v462_v56, %v103_v0  ;;  %vm136_vm10 = vweird.f32 %v466_v63  ;;  %v433_v54 = vld [vmem:[%s663_s5 + $0x18] sm:$0xff] }
 0x106   :  { %v110_v5 = vmul.f32 %v468_v1, %v95_v55  ;;  %469 = vrsqrt.f32 %v98_v6  ;;  %vm116_vm6 = vweird.f32 %v468_v1  ;;  %vm137_vm13 = vmor %vm135_vm9, %vm136_vm10  ;;  %v124_v31 = vmul.f32 %v464_v61, %v123_v26  ;;  %v432_v55 = vld [vmem:[%s663_s5 + $0x10] sm:$0xff] }
 0x107   :  { %v131_v7 = vmul.f32 %v466_v63, %v130_v2  ;;  %v108_v10 = vsel %vm107_vm5, %v462_v56, %v104_v4  ;;  %vm117_vm8 = vmor %vm115_vm7, %vm116_vm6  ;;  %vm145_vm15 = vweird.f32 %v98_v6  ;;  %v431_v56 = vld [vmem:[%s663_s5 + $0x8] sm:$0xff] }
 0x108   :  { %v111_v8 = vmul.f32 %v468_v1, %v110_v5  ;;  %v149_v14 = vmul.f32 %v108_v10, %v549_v22  ;;  %v128_v37 = vsel %vm127_vm14, %v464_v61, %v124_v31 }
 0x109   :  { %v132_v12 = vmul.f32 0.5, %v131_v7  ;;  %v151_v40 = vmul.f32 %v128_v37, %v547_v21  ;;  %v437_v21 = vld [vmem:[%s663_s5 + $0x38] sm:$0xff] }
 0x10a   :  { %v112_v11 = vmul.f32 0.5, %v111_v8  ;;  %v158_v24 = vmul.f32 %v455_v15, %v149_v14  ;;  %343 = vmatpush.bf16.msra.mxu1 %v437_v21  ;;  %438 = vmatpush.bf16.msra.mxu2 %v437_v21 }
 0x10b   :  { %v133_v18 = vsub.f32 1.5, %v132_v12  ;;  %v160_v43 = vmul.f32 %v455_v15, %v151_v40  ;;  %439 = vmatpush.bf16.msra.mxu3 %v437_v21 }
 0x10c   :  { %v113_v13 = vsub.f32 1.5, %v112_v11  ;;  %v470_v20 = vpop.eup %469  ;;  %v167_v29 = vadd.f32 %v456_v25, %v158_v24 }
 0x10d   :  { %v134_v27 = vmul.f32 %v466_v63, %v133_v18  ;;  %v140_v28 = vmul.f32 %v470_v20, %v98_v6  ;;  %vm146_vm2 = vweird.f32 %v470_v20  ;;  %v169_v46 = vadd.f32 %v456_v25, %v160_v43 }
 0x10e   :  { %v114_v17 = vmul.f32 %v468_v1, %v113_v13  ;;  %vm147_vm3 = vmor %vm145_vm15, %vm146_vm2  ;;  %344 = vmatpush.bf16.msra.mxu1 %v436_v52  ;;  %440 = vmatpush.bf16.msra.mxu2 %v436_v52 }
 0x10f   :  { %v141_v36 = vmul.f32 %v470_v20, %v140_v28  ;;  %441 = vmatpush.bf16.msra.mxu3 %v436_v52 }
 0x110   :  { %v118_v19 = vsel %vm117_vm8, %v468_v1, %v114_v17 }
 0x111   :  { %v150_v23 = vmul.f32 %v118_v19, %v559_v34  ;;  %v138_v34 = vsel %vm137_vm13, %v466_v63, %v134_v27  ;;  %v142_v39 = vmul.f32 0.5, %v141_v36 }
 0x112   :  { %v152_v38 = vmul.f32 %v138_v34, %v557_v33 }
 0x113   :  { %v159_v22 = vmul.f32 %v455_v15, %v150_v23  ;;  %v143_v42 = vsub.f32 1.5, %v142_v39 }
 0x114   :  { %v161_v41 = vmul.f32 %v455_v15, %v152_v38 }
 0x115   :  { %v168_v30 = vadd.f32 %v456_v25, %v159_v22  ;;  %v144_v45 = vmul.f32 %v470_v20, %v143_v42 }
 0x116   :  { %v170_v44 = vadd.f32 %v456_v25, %v161_v41 }
 0x117   :  { %v172_v32 = vpack.c.bf16 %v168_v30, %v167_v29  ;;  %v148_v48 = vsel %vm147_vm3, %v470_v20, %v144_v45 }
 0x118   :  { %v173_v47 = vpack.c.bf16 %v170_v44, %v169_v46  ;;  %v153_v49 = vmul.f32 %v148_v48, %v561_v35  ;;  %v435_v35 = vld [vmem:[%s663_s5 + $0x28] sm:$0xff] }
 0x119   :  { %393 = vmatmul.msk.bf16.vlgmr.msra.gmra.mxu0 %vm35_vm0, %v172_v32  ;;  %345 = vmatpush.bf16.msra.mxu1 %v435_v35 }
 0x11a   :  { %v162_v50 = vmul.f32 %v455_v15, %v153_v49  ;;  %442 = vmatpush.bf16.msra.mxu2 %v435_v35  ;;  %443 = vmatpush.bf16.msra.mxu3 %v435_v35 }
 0x11c   :  { %v171_v33 = vadd.f32 %v456_v25, %v162_v50 }
 0x11d   :  { %346 = vmatpush.bf16.msra.mxu1 %v434_v53 }
 0x11e   :  { %v174_v51 = vpack.c.bf16 %v171_v33, %v171_v33  ;;  %444 = vmatpush.bf16.msra.mxu2 %v434_v53  ;;  %445 = vmatpush.bf16.msra.mxu3 %v434_v53 }
 0x121   :  { %347 = vmatpush.bf16.msra.mxu1 %v433_v54 }
 0x122   :  { %446 = vmatpush.bf16.msra.mxu2 %v433_v54  ;;  %447 = vmatpush.bf16.msra.mxu3 %v433_v54  ;;  %v458_v54 = vld [vmem:[%s662_s6] ss:$0 sm:$0xff] }
 0x125   :  { %348 = vmatpush.bf16.msra.mxu1 %v432_v55 }
 0x126   :  { %448 = vmatpush.bf16.msra.mxu2 %v432_v55  ;;  %449 = vmatpush.bf16.msra.mxu3 %v432_v55 }
 0x129   :  { %394 = vmatmul.msk.bf16.gmra.mxu0 %vm35_vm0, %v173_v47  ;;  %349 = vmatpush.bf16.msra.mxu1 %v431_v56 }
 0x12a   :  { %450 = vmatpush.bf16.msra.mxu2 %v431_v56  ;;  %451 = vmatpush.bf16.msra.mxu3 %v431_v56  ;;  %v366_v56 = vld [vmem:[%s664_s7] sm:$0xff] }
 0x12d   :  { %350 = vmatpush.bf16.msra.mxu1 %v430_v58 }
 0x12e   :  { %452 = vmatpush.bf16.msra.mxu2 %v430_v58  ;;  %453 = vmatpush.bf16.msra.mxu3 %v430_v58 }
 0x139   :  { %395 = vmatmul.msk.bf16.gmra.mxu0 %vm35_vm0, %v174_v51 }
 0x196   :  { %v213_v59 = vpop.f32.mrf.mxu0 }
 0x197   :  { %v214_v60 = vadd.f32 %v457_v57, %v213_v59 }
 0x199   :  { %v227_v61 = vmul.f32 %v214_v60, %v214_v60 }
 0x19b   :  { %v232_v62 = vmul.f32 %v227_v61, %v214_v60 }
 0x19d   :  { %v237_v63 = vmul.f32 0.044715, %v232_v62 }
 0x19e   :  { %v215_v0 = vpop.f32.mrf.mxu0 }
 0x19f   :  { %v242_v1 = vadd.f32 %v237_v63, %v214_v60  ;;  %v216_v2 = vadd.f32 %v457_v57, %v215_v0  ;;  %v368_v0 = vld [vmem:[%s664_s7 + $0x10] sm:$0xff] }
 0x1a1   :  { %v228_v3 = vmul.f32 %v216_v2, %v216_v2  ;;  %v247_v4 = vmul.f32 0.7978846, %v242_v1 }
 0x1a3   :  { %v233_v5 = vmul.f32 %v228_v3, %v216_v2  ;;  %471 = vtanh.f32 %v247_v4  ;;  %v369_v4 = vld [vmem:[%s664_s7 + $0x18] sm:$0xff] }
 0x1a5   :  { %v238_v6 = vmul.f32 0.044715, %v233_v5 }
 0x1a6   :  { %v218_v7 = vpop.f32.mrf.mxu0 }
 0x1a7   :  { %v243_v8 = vadd.f32 %v238_v6, %v216_v2  ;;  %v219_v9 = vadd.f32 %v457_v57, %v218_v7  ;;  %v370_v6 = vld [vmem:[%s664_s7 + $0x20] sm:$0x3] }
 0x1a9   :  { %v229_v10 = vmul.f32 %v219_v9, %v219_v9  ;;  %v248_v11 = vmul.f32 0.7978846, %v243_v8  ;;  %v472_v12 = vpop.eup %471 }
 0x1aa   :  { %v257_v16 = vadd.f32 1.0, %v472_v12 }
 0x1ab   :  { %v234_v13 = vmul.f32 %v229_v10, %v219_v9  ;;  %473 = vtanh.f32 %v248_v11 }
 0x1ac   :  { %v262_v25 = vmul.f32 0.5, %v257_v16 }
 0x1ad   :  { %v239_v14 = vmul.f32 0.044715, %v234_v13 }
 0x1ae   :  { %v220_v15 = vpop.f32.mrf.mxu0  ;;  %v267_v29 = vmul.f32 %v262_v25, %v214_v60  ;;  %v367_v60 = vld [vmem:[%s664_s7 + $0x8] sm:$0xff] }
 0x1af   :  { %v244_v17 = vadd.f32 %v239_v14, %v219_v9  ;;  %v221_v18 = vadd.f32 %v457_v57, %v220_v15 }
 0x1b1   :  { %v474_v19 = vpop.eup %473  ;;  %v230_v20 = vmul.f32 %v221_v18, %v221_v18  ;;  %v249_v23 = vmul.f32 0.7978846, %v244_v17 }
 0x1b2   :  { %v258_v24 = vadd.f32 1.0, %v474_v19 }
 0x1b3   :  { %v235_v26 = vmul.f32 %v230_v20, %v221_v18  ;;  %475 = vtanh.f32 %v249_v23 }
 0x1b4   :  { %v263_v22 = vmul.f32 0.5, %v258_v24 }
 0x1b5   :  { %v240_v27 = vmul.f32 0.044715, %v235_v26 }
 0x1b6   :  { %v223_v28 = vpop.f32.mrf.mxu0  ;;  %v268_v30 = vmul.f32 %v263_v22, %v216_v2 }
 0x1b7   :  { %v245_v31 = vadd.f32 %v240_v27, %v221_v18  ;;  %v224_v32 = vadd.f32 %v457_v57, %v223_v28 }
 0x1b8   :  { %v272_v34 = vpack.c.bf16 %v268_v30, %v267_v29 }
 0x1b9   :  { %v231_v36 = vmul.f32 %v224_v32, %v224_v32  ;;  %v250_v37 = vmul.f32 0.7978846, %v245_v31  ;;  %v476_v38 = vpop.eup %475 }
 0x1ba   :  { %351 = vmatmul.bf16.vlgmr.msra.gmra.mxu1 %v272_v34  ;;  %v259_v42 = vadd.f32 1.0, %v476_v38 }
 0x1bb   :  { %v236_v39 = vmul.f32 %v231_v36, %v224_v32  ;;  %477 = vtanh.f32 %v250_v37 }
 0x1bc   :  { %v264_v47 = vmul.f32 0.5, %v259_v42 }
 0x1bd   :  { %v241_v40 = vmul.f32 0.044715, %v236_v39 }
 0x1be   :  { %v225_v41 = vpop.f32.mrf.mxu0  ;;  %v269_v49 = vmul.f32 %v264_v47, %v219_v9 }
 0x1bf   :  { %v246_v43 = vadd.f32 %v241_v40, %v224_v32 }
 0x1c1   :  { %v478_v44 = vpop.eup %477  ;;  %v251_v45 = vmul.f32 0.7978846, %v246_v43 }
 0x1c2   :  { %v260_v46 = vadd.f32 1.0, %v478_v44 }
 0x1c3   :  { %479 = vtanh.f32 %v251_v45 }
 0x1c4   :  { %v265_v48 = vmul.f32 0.5, %v260_v46 }
 0x1c6   :  { %v270_v50 = vmul.f32 %v265_v48, %v221_v18 }
 0x1c8   :  { %v273_v33 = vpack.c.bf16 %v270_v50, %v269_v49 }
 0x1c9   :  { %v480_v51 = vpop.eup %479 }
 0x1ca   :  { %356 = vmatmul.bf16.vlgmr.msra.gmra.mxu2 %v273_v33  ;;  %v261_v21 = vadd.f32 1.0, %v480_v51 }
 0x1cc   :  { %v266_v52 = vmul.f32 0.5, %v261_v21 }
 0x1ce   :  { %v271_v35 = vmul.f32 %v266_v52, %v224_v32 }
 0x1d0   :  { %v274_v53 = vpack.c.bf16 %v271_v35, %v271_v35 }
 0x1d2   :  { %361 = vmatmul.bf16.vlgmr.msra.gmra.mxu3 %v274_v53 }
 0x237   :  { %v352_v55 = vpop.f32.mrf.mxu1 }
 0x238   :  { %v353_v57 = vadd.f32 %v458_v54, %v352_v55 }
 0x23a   :  { %v371_v58 = vadd.f32 %v366_v56, %v353_v57 }
 0x23c   :  { %376 = vst.msk [vmem:[%s665_s8] sm:$0xff] %vm35_vm0, %v371_v58 }
 0x23f   :  { %v354_v59 = vpop.f32.mrf.mxu1 }
 0x240   :  { %v355_v61 = vadd.f32 %v458_v54, %v354_v59 }
 0x242   :  { %v372_v62 = vadd.f32 %v367_v60, %v355_v61 }
 0x244   :  { %377 = vst.msk [vmem:[%s665_s8 + $0x8] sm:$0xff] %vm35_vm0, %v372_v62 }
 0x24d   :  { %v357_v63 = vpop.f32.mrf.mxu2 }
 0x24e   :  { %v358_v1 = vadd.f32 %v458_v54, %v357_v63 }
 0x250   :  { %v373_v2 = vadd.f32 %v368_v0, %v358_v1 }
 0x252   :  { %378 = vst.msk [vmem:[%s665_s8 + $0x10] sm:$0xff] %vm35_vm0, %v373_v2 }
 0x255   :  { %v359_v3 = vpop.f32.mrf.mxu2  ;;  %v362_v5 = vpop.f32.mrf.mxu3 }
 0x256   :  { %v360_v7 = vadd.f32 %v458_v54, %v359_v3  ;;  %v363_v8 = vadd.f32 %v458_v54, %v362_v5 }
 0x258   :  { %v374_v9 = vadd.f32 %v369_v4, %v360_v7  ;;  %v375_v10 = vadd.f32 %v370_v6, %v363_v8 }
 0x25a   :  { %379 = vst.msk [vmem:[%s665_s8 + $0x18] sm:$0xff] %vm35_vm0, %v374_v9 }
 0x25b   :  { %380 = vst.msk [vmem:[%s665_s8 + $0x20] sm:$0x3] %vm48_vm1, %v375_v10 }
 0x25d   :  { %v364_v11 = vpop.f32.mrf.mxu3 }

// kernel: decoder_forward.10
= control target key start
LH: loop header
LB: loop body
LE: loop exit
PB: predicated region body
PF: predicated region fallthrough
CT: control target
= control target key end

     0   :  { %s1063_s15 = smov 0   ;;  %s1259_s0 = inlined_call_operand.vmem [shape: f32[2,17,96], index: 0, kind: input, shape index: {}]   ;;  %s1260_s1 = inlined_call_operand.vmem [shape: bf16[32,32], index: 1, kind: input, shape index: {}]   ;;  %s1261_s2 = inlined_call_operand.vmem [shape: f32[1,32], index: 2, kind: input, shape index: {}]   ;;  %s1262_s3 = inlined_call_operand.vmem [shape: f32[2,17,32], index: 3, kind: input, shape index: {}]   ;;  %s1263_s4 = inlined_call_operand.vmem [shape: f32[2,17,32], index: 4, kind: output, shape index: {}]  }
   0x1 LB: > { %s914_s16 = sadd.s32 4294967295, %s1024_s15   ;;  %p918_p0 = scmp.ge.s32.totalorder %s1024_s15, 1  ;;  %s1024_s15 = sphi %s1063_s15, %s14_s15  }
   0x2   : > { %p172_p1 = scmp.lt.s32.totalorder %s1024_s15, 3 }
   0x4   : > { %p173_p2 = pnand %p918_p0, %p172_p1 }
   0x5   : > { %p203_p3 = scmp.lt.s32.totalorder (!%p173_p2), %s914_s16, 1  ;;  %s1026_s21 = smov (!%p173_p2), 96  }
   0x6   : > { %176 = sbr.rel (%p173_p2) target bundleno = 1566 (0x61e), region = 36  ;;  %s1027_s22 = smov (!%p173_p2), 120  }
   0x7   : > { %s1028_s23 = smov (!%p173_p2), 88   ;;  %s1029_s24 = smov (!%p173_p2), 64  }
   0x8   : > { %s1030_s25 = smov (!%p173_p2), 56   ;;  %s1031_s26 = smov (!%p173_p2), 80  }
   0x9   : > { %s1033_s27 = smov (!%p173_p2), 112   ;;  %s1034_s28 = smov (!%p173_p2), 72  }
   0xa   : > { %s1035_s10 = smov (!%p173_p2), 104   ;;  %s1036_s13 = smov (!%p173_p2), 48  }
   0xb   : > { %s1265_s16 = smov (!%p203_p3, %s914_s16), 1  ;;  %vm245_vm0 = vcmask 64512   ;;  %vm276_vm1 = vcmask 138240   ;;  %vm283_vm2 = vcmask 131072   ;;  %vm324_vm3 = vcmask 1040384   ;;  %s1037_s14 = smov 40  }
   0xc   : > { %s1071_s17 = smul.u32 24, %s1265_s16  ;;  %v1032_v47 = vmov 0   ;;  %vm360_vm4 = vcmask 1043456   ;;  %vm229_vm5 = vcmask 261120   ;;  %vm232_vm6 = vcmask 253952  }
   0xd   : > { %v1123_v48 = vsel %vm324_vm3, 65535, %v1032_v47 }
   0xe   : > { %s1077_s20 = scalar_lea.vmem %s1259_s0, %s1071_s17  ;;  %s1159_s7 = scalar_lea.vmem %s1262_s3, %s1071_s17 }
   0xf   : > { %v236_v0 = vld [vmem:[%s1077_s20 + $0x10] sm:$0x1]  ;;  %v234_v1 = vld [vmem:[%s1077_s20] sm:$0xff]  ;;  %v235_v2 = vld [vmem:[%s1077_s20 + $0x8] sm:$0xff] }
  0x10   : > { %v238_v3 = vpack.c.bf16 %v236_v0, %v236_v0  ;;  %v1082_v4 = vpack.c.bf16 %v235_v2, %v234_v1  ;;  %v390_v5 = vld [vmem:[%s1077_s20 + $0x10] sm:$0x1] }
  0x11   : > { %v1085_v6 = vpack.c.bf16 %v390_v5, %v390_v5  ;;  %v541_v58 = vld [vmem:[%s1077_s20 + $0x10] sm:$0x1] }
  0x12   : > { %243 = vrot.lane.b32.xlu0 %v238_v3, %s1026_s21  ;;  %395 = vrot.lane.b32.xlu2 %v1082_v4, %s1027_s22  ;;  %v1136_v59 = vpack.c.bf16 %v541_v58, %v541_v58 }
  0x13   : > { %401 = vrot.lane.b32.xlu1 %v1085_v6, %s1028_s23 }
  0x1a   : > { %241 = vrot.lane.b32.xlu0 %v1082_v4, %s1026_s21 }
  0x1b   : > { %399 = vrot.lane.b32.xlu1 %v1082_v4, %s1028_s23  ;;  %s217_s23 = scalar_lea.vmem %s1263_s4, %s1071_s17 }
  0x23   : > { %397 = vrot.lane.b32.xlu1 %v1085_v6, %s1027_s22 }
  0x6c   : > { %v396_v15 = vpop.permute.xlu2 %395 }
  0x84   : > { %v244_v7 = vpop.permute.xlu0 %243 }
  0x85   : > { %v256_v8 = vsel %vm245_vm0, %v244_v7, 0  ;;  %v402_v9 = vpop.permute.xlu1 %401 }
  0x86   : > { %264 = vmatpush.bf16.xpose.msra.mxu0 %v256_v8  ;;  %v413_v10 = vsel %vm245_vm0, %v402_v9, 0 }
  0x87   : > { %421 = vmatpush.bf16.xpose.msra.mxu3 %v413_v10 }
  0x8c   : > { %v242_v11 = vpop.permute.xlu0 %241 }
  0x8d   : > { %v253_v12 = vsel %vm245_vm0, %v242_v11, 0  ;;  %v400_v13 = vpop.permute.xlu1 %399 }
  0x8e   : > { %265 = vmatpush.bf16.xpose.msra.mxu0 %v253_v12  ;;  %v410_v14 = vsel %vm245_vm0, %v400_v13, 0 }
  0x8f   : > { %422 = vmatpush.bf16.xpose.msra.mxu3 %v410_v14 }
  0x95   : > { %922 = vmatmul.msk.bf16.vlgmr.msra.gmra.mxu0 %vm245_vm0, %v1082_v4  ;;  %v398_v16 = vpop.permute.xlu1 %397 }
  0x96   : > { %928 = vmatmul.msk.bf16.vlgmr.msra.gmra.mxu3 %vm245_vm0, %v396_v15 }
  0xa5   : > { %923 = vmatmul.msk.bf16.gmra.mxu0 %vm245_vm0, %v238_v3 }
  0xa6   : > { %929 = vmatmul.msk.bf16.gmra.mxu3 %vm245_vm0, %v398_v16 }
 0x112   : > { %v267_v17 = vpop.f32.mrf.mxu0 }
 0x113   : > { %v277_v18 = vsel %vm276_vm1, %v267_v17, -inf }
 0x114   : > { %278 = vmax.xlane.f32.xlu2 %v277_v18 }
 0x119   : > { %v1105_v24 = vpop.f32.mrf.mxu3 }
 0x11a   : > { %v269_v19 = vpop.f32.mrf.mxu0  ;;  %v433_v44 = vsel %vm276_vm1, %v1105_v24, -inf }
 0x11b   : > { %v280_v20 = vsel %vm276_vm1, %v269_v19, -inf }
 0x11c   : > { %281 = vmax.xlane.f32.xlu0 %v280_v20 }
 0x121   : > { %v426_v25 = vpop.f32.mrf.mxu3 }
 0x122   : > { %v272_v21 = vpop.f32.mrf.mxu0  ;;  %v436_v26 = vsel %vm276_vm1, %v426_v25, -inf }
 0x123   : > { %v284_v22 = vsel %vm283_vm2, %v272_v21, -inf }
 0x124   : > { %285 = vmax.xlane.f32.xlu1 %v284_v22 }
 0x129   : > { %v1110_v30 = vpop.f32.mrf.mxu3 }
 0x12a   : > { %v274_v23 = vpop.f32.mrf.mxu0  ;;  %v439_v45 = vsel %vm283_vm2, %v1110_v30, -inf }
 0x130   : > { %315 = vrot.lane.b32.xlu0 %v238_v3, %s1029_s24 }
 0x131   : > { %v431_v36 = vpop.f32.mrf.mxu3 }
 0x132   : > { %v969_v36 = vld [vmem:[%s1261_s2] ss:$0 sm:$0xff] }
 0x15a   : > { %437 = vmax.xlane.f32.xlu0 %v436_v26 }
 0x16e   : > { %468 = vrot.lane.b32.xlu0 %v1082_v4, %s1030_s25 }
 0x176   : > { %550 = vrot.lane.b32.xlu0 %v1082_v4, %s1031_s26 }
 0x17e   : > { %546 = vrot.lane.b32.xlu0 %v1082_v4, %s1033_s27 }
 0x186   : > { %701 = vrot.lane.b32.xlu0 %v1082_v4, %s1034_s28 }
 0x187   : > { %v279_v27 = vpop.xlane.xlu2 %278 }
 0x188   : > { %v287_v28 = vsub.f32 %v267_v17, %v279_v27  ;;  %v348_v17 = vld [vmem:[%s1260_s1] sm:$0xf] }
 0x189   : > { %v362_v18 = vsel %vm360_vm4, %v348_v17, 0 }
 0x18a   : > { %v290_v29 = vmul.f32 1.442695, %v287_v28  ;;  %371 = vmatpush.bf16.msra.mxu2 %v362_v18 }
 0x18c   : > { %970 = vpow2.f32 %v290_v29 }
 0x18e   : > { %548 = vrot.lane.b32.xlu0 %v1136_v59, %s1033_s27 }
 0x18f   : > { %v282_v31 = vpop.xlane.xlu0 %281 }
 0x190   : > { %v288_v32 = vsub.f32 %v269_v19, %v282_v31 }
 0x192   : > { %v971_v33 = vpop.eup %970  ;;  %v292_v34 = vmul.f32 1.442695, %v288_v32 }
 0x193   : > { %v296_v35 = vsel %vm276_vm1, %v971_v33, 0.0 }
 0x194   : > { %972 = vpow2.f32 %v292_v34  ;;  %297 = vadd.xlane.f32.xlu2 %v296_v35  ;;  %v692_v34 = vld [vmem:[%s1077_s20 + $0x10] sm:$0x1]  ;;  %v219_v35 = vld [vmem:[%s1159_s7] sm:$0xff] }
 0x197   : > { %v286_v37 = vpop.xlane.xlu1 %285 }
 0x198   : > { %v289_v38 = vsub.f32 %v272_v21, %v286_v37  ;;  %v1167_v37 = vpack.c.bf16 %v692_v34, %v692_v34 }
 0x19a   : > { %v973_v39 = vpop.eup %972  ;;  %v294_v40 = vmul.f32 1.442695, %v289_v38  ;;  %v226_v38 = vadd.f32 %v969_v36, %v219_v35 }
 0x19b   : > { %v299_v41 = vsel %vm276_vm1, %v973_v39, 0.0 }
 0x19c   : > { %974 = vpow2.f32 %v294_v40  ;;  %300 = vadd.xlane.f32.xlu2 %v299_v41  ;;  %230 = vst.msk [vmem:[#allocation2] sm:$0xff] %vm229_vm5, %v226_v38 }
 0x1a2   : > { %v975_v42 = vpop.eup %974  ;;  %v316_v46 = vpop.permute.xlu0 %315 }
 0x1a3   : > { %v302_v43 = vsel %vm283_vm2, %v975_v42, 0.0  ;;  %v328_v49 = vand.u32 %v1123_v48, %v316_v46 }
 0x1a4   : > { %303 = vadd.xlane.f32.xlu1 %v302_v43 }
 0x1a5   : > { %336 = vmatpush.bf16.msra.mxu1 %v328_v49 }
 0x1ac   : > { %434 = vmax.xlane.f32.xlu1 %v433_v44 }
 0x1b4   : > { %440 = vmax.xlane.f32.xlu1 %v439_v45  ;;  %313 = vrot.lane.b32.xlu2 %v1082_v4, %s1029_s24 }
 0x1cd   : > { %v438_v50 = vpop.xlane.xlu0 %437 }
 0x1ce   : > { %v443_v51 = vsub.f32 %v426_v25, %v438_v50 }
 0x1d0   : > { %v447_v52 = vmul.f32 1.442695, %v443_v51  ;;  %v220_v51 = vld [vmem:[%s1159_s7 + $0x8] sm:$0xff] }
 0x1d2   : > { %976 = vpow2.f32 %v447_v52  ;;  %v227_v52 = vadd.f32 %v969_v36, %v220_v51 }
 0x1d4   : > { %231 = vst.msk [vmem:[#allocation2 + $0x8] sm:$0xff] %vm229_vm5, %v227_v52 }
 0x1d8   : > { %v1129_v53 = vpop.eup %976 }
 0x1d9   : > { %v454_v54 = vsel %vm276_vm1, %v1129_v53, 0.0 }
 0x1da   : > { %455 = vadd.xlane.f32.xlu1 %v454_v54  ;;  %v221_v54 = vld [vmem:[%s1159_s7 + $0x10] sm:$0x1] }
 0x1e0   : > { %v469_v21 = vpop.permute.xlu0 %468 }
 0x1e8   : > { %v551_v29 = vpop.permute.xlu0 %550 }
 0x1f3   : > { %470 = vrot.lane.b32.xlu1 %v1085_v6, %s1030_s25 }
 0x207   : > { %v298_v55 = vpop.xlane.xlu2 %297 }
 0x208   : > { %978 = vrcp.f32 %v298_v55  ;;  %v228_v55 = vadd.f32 %v969_v36, %v221_v54 }
 0x20a   : > { %233 = vst.msk [vmem:[#allocation2 + $0x10] sm:$0x1] %vm232_vm6, %v228_v55 }
 0x20e   : > { %v979_v57 = vpop.eup %978 }
 0x20f   : > { %v301_v56 = vpop.xlane.xlu2 %300  ;;  %v308_v63 = vmul.f32 %v979_v57, %v971_v33  ;;  %v547_v33 = vpop.permute.xlu0 %546  ;;  %v349_v57 = vld [vmem:[#allocation2] sm:$0xff] }
 0x210   : > { %980 = vrcp.f32 %v301_v56 }
 0x216   : > { %v981_v60 = vpop.eup %980 }
 0x217   : > { %v314_v61 = vpop.permute.xlu2 %313  ;;  %v304_v62 = vpop.xlane.xlu1 %303  ;;  %v309_v0 = vmul.f32 %v981_v60, %v973_v39 }
 0x218   : > { %337 = vmatpush.bf16.msra.mxu1 %v314_v61  ;;  %982 = vrcp.f32 %v304_v62  ;;  %v702_v40 = vpop.permute.xlu0 %701  ;;  %v350_v61 = vld [vmem:[#allocation2 + $0x8] sm:$0xff] }
 0x219   : > { %v311_v1 = vpack.c.bf16 %v309_v0, %v308_v63 }
 0x21b   : > { %924 = vmatmul.msk.bf16.vlgmr.msra.gmra.mxu1 %vm276_vm1, %v311_v1 }
 0x21e   : > { %v983_v5 = vpop.eup %982 }
 0x21f   : > { %v435_v2 = vpop.xlane.xlu1 %434  ;;  %v310_v7 = vmul.f32 %v983_v5, %v975_v42  ;;  %v712_v5 = vsel %vm245_vm0, %v702_v40, 0 }
 0x220   : > { %v442_v3 = vsub.f32 %v1105_v24, %v435_v2  ;;  %v549_v46 = vpop.permute.xlu0 %548  ;;  %v351_v2 = vld [vmem:[#allocation2 + $0x10] sm:$0x1] }
 0x221   : > { %v312_v10 = vpack.c.bf16 %v310_v7, %v310_v7 }
 0x222   : > { %v445_v6 = vmul.f32 1.442695, %v442_v3 }
 0x224   : > { %984 = vpow2.f32 %v445_v6 }
 0x227   : > { %v441_v8 = vpop.xlane.xlu1 %440 }
 0x228   : > { %v444_v9 = vsub.f32 %v1110_v30, %v441_v8  ;;  %v561_v30 = vsel %vm245_vm0, %v551_v29, 0 }
 0x22a   : > { %v985_v11 = vpop.eup %984  ;;  %v449_v12 = vmul.f32 1.442695, %v444_v9 }
 0x22b   : > { %925 = vmatmul.msk.bf16.gmra.mxu1 %vm276_vm1, %v312_v10  ;;  %v451_v13 = vsel %vm276_vm1, %v985_v11, 0.0 }
 0x22c   : > { %986 = vpow2.f32 %v449_v12  ;;  %452 = vadd.xlane.f32.xlu2 %v451_v13 }
 0x232   : > { %v987_v14 = vpop.eup %986 }
 0x233   : > { %v457_v15 = vsel %vm283_vm2, %v987_v14, 0.0 }
 0x234   : > { %458 = vadd.xlane.f32.xlu1 %v457_v15 }
 0x244   : > { %552 = vrot.lane.b32.xlu2 %v1136_v59, %s1031_s26 }
 0x24c   : > { %703 = vrot.lane.b32.xlu2 %v1167_v37, %s1034_s28 }
 0x24d   : > { %v456_v16 = vpop.xlane.xlu1 %455  ;;  %699 = vrot.lane.b32.xlu1 %v1167_v37, %s1035_s10 }
 0x254   : > { %697 = vrot.lane.b32.xlu2 %v1082_v4, %s1035_s10 }
 0x265   : > { %v471_v19 = vpop.permute.xlu1 %470 }
 0x266   : > { %v480_v20 = vand.u32 %v471_v19, %v1123_v48 }
 0x268   : > { %488 = vmatpush.bf16.msrb.mxu2 %v480_v20 }
 0x26c   : > { %489 = vmatpush.bf16.msrb.mxu2 %v469_v21 }
 0x298   : > { %v339_v22 = vpop.f32.mrf.mxu1 }
 0x29f   : > { %v453_v23 = vpop.xlane.xlu2 %452 }
 0x2a0   : > { %v341_v24 = vpop.f32.mrf.mxu1  ;;  %988 = vrcp.f32 %v453_v23 }
 0x2a1   : > { %v352_v25 = vpack.c.bf16 %v341_v24, %v339_v22  ;;  %990 = vrcp.f32 %v456_v16 }
 0x2a3   : > { %926 = vmatmul.msk.bf16.vlgmr.msra.gmra.mxu2 %vm245_vm0, %v352_v25 }
 0x2a6   : > { %v989_v39 = vpop.eup %988 }
 0x2a7   : > { %v553_v26 = vpop.permute.xlu2 %552  ;;  %v991_v41 = vpop.eup %990  ;;  %v463_v42 = vmul.f32 %v989_v39, %v985_v11 }
 0x2a8   : > { %v344_v27 = vpop.f32.mrf.mxu1  ;;  %v564_v28 = vsel %vm245_vm0, %v553_v26, 0  ;;  %v464_v43 = vmul.f32 %v991_v41, %v1129_v53  ;;  %v459_v44 = vpop.xlane.xlu1 %458  ;;  %v500_v53 = vld [vmem:[%s1260_s1 + $0x4] sm:$0xf] }
 0x2a9   : > { %572 = vmatpush.bf16.xpose.msrb.mxu0 %v564_v28  ;;  %v353_v32 = vpack.c.bf16 %v344_v27, %v344_v27  ;;  %992 = vrcp.f32 %v459_v44  ;;  %v513_v56 = vsel %vm360_vm4, %v500_v53, 0 }
 0x2aa   : > { %v466_v45 = vpack.c.bf16 %v464_v43, %v463_v42  ;;  %522 = vmatpush.bf16.msrb.mxu1 %v513_v56 }
 0x2af   : > { %v993_v47 = vpop.eup %992  ;;  %v704_v0 = vpop.permute.xlu2 %703 }
 0x2b0   : > { %v346_v31 = vpop.f32.mrf.mxu1  ;;  %v465_v49 = vmul.f32 %v993_v47, %v987_v14  ;;  %v715_v1 = vsel %vm245_vm0, %v704_v0, 0 }
 0x2b1   : > { %573 = vmatpush.bf16.xpose.msrb.mxu0 %v561_v30  ;;  %723 = vmatpush.bf16.xpose.msra.mxu1 %v715_v1 }
 0x2b2   : > { %v467_v50 = vpack.c.bf16 %v465_v49, %v465_v49 }
 0x2b3   : > { %927 = vmatmul.msk.bf16.gmra.mxu2 %vm245_vm0, %v353_v32 }
 0x2b7   : > { %v698_v21 = vpop.permute.xlu2 %697 }
 0x2b8   : > { %934 = vmatmul.msk.bf16.vlgmr.msrb.gmra.mxu0 %vm245_vm0, %v547_v33 }
 0x2b9   : > { %724 = vmatpush.bf16.xpose.msra.mxu1 %v712_v5 }
 0x2bf   : > { %v700_v22 = vpop.permute.xlu1 %699 }
 0x2c3   : > { %930 = vmatmul.msk.bf16.vlgmr.msrb.gmra.mxu2 %vm276_vm1, %v466_v45 }
 0x2c8   : > { %935 = vmatmul.msk.bf16.gmra.mxu0 %vm245_vm0, %v549_v46 }
 0x2d3   : > { %931 = vmatmul.msk.bf16.gmra.mxu2 %vm276_vm1, %v467_v50 }
 0x326   : > { %v373_v58 = vpop.f32.mrf.mxu2 }
 0x327   : > { %v382_v60 = vadd.f32 %v373_v58, %v349_v57 }
 0x329   : > { %385 = vst.msk [vmem:[#allocation2] sm:$0xff] %vm229_vm5, %v382_v60 }
 0x32e   : > { %v375_v62 = vpop.f32.mrf.mxu2 }
 0x32f   : > { %v383_v63 = vadd.f32 %v375_v62, %v350_v61 }
 0x330   : > { %v501_v28 = vld [vmem:[#allocation2] sm:$0xff] }
 0x331   : > { %386 = vst.msk [vmem:[#allocation2 + $0x8] sm:$0xff] %vm229_vm5, %v383_v63 }
 0x335   : > { %v575_v3 = vpop.f32.mrf.mxu0 }
 0x336   : > { %v378_v6 = vpop.f32.mrf.mxu2  ;;  %v584_v7 = vsel %vm276_vm1, %v575_v3, -inf }
 0x337   : > { %v384_v8 = vadd.f32 %v378_v6, %v351_v2  ;;  %585 = vmax.xlane.f32.xlu2 %v584_v7 }
 0x338   : > { %v502_v31 = vld [vmem:[#allocation2 + $0x8] sm:$0xff] }
 0x339   : > { %387 = vst.msk [vmem:[#allocation2 + $0x10] sm:$0x1] %vm232_vm6, %v384_v8 }
 0x33d   : > { %v577_v9 = vpop.f32.mrf.mxu0 }
 0x33e   : > { %v380_v10 = vpop.f32.mrf.mxu2  ;;  %v587_v11 = vsel %vm276_vm1, %v577_v9, -inf }
 0x33f   : > { %588 = vmax.xlane.f32.xlu0 %v587_v11 }
 0x340   : > { %v503_v34 = vld [vmem:[#allocation2 + $0x10] sm:$0x1] }
 0x345   : > { %v1196_v18 = vpop.f32.mrf.mxu0 }
 0x346   : > { %v491_v12 = vpop.f32.mrf.mxu2  ;;  %v590_v19 = vsel %vm283_vm2, %v1196_v18, -inf }
 0x347   : > { %591 = vmax.xlane.f32.xlu0 %v590_v19 }
 0x34d   : > { %v582_v20 = vpop.f32.mrf.mxu0 }
 0x34e   : > { %v493_v13 = vpop.f32.mrf.mxu2 }
 0x34f   : > { %v504_v14 = vpack.c.bf16 %v493_v13, %v491_v12 }
 0x351   : > { %932 = vmatmul.msk.bf16.vlgmr.msrb.gmra.mxu1 %vm245_vm0, %v504_v14 }
 0x356   : > { %v496_v15 = vpop.f32.mrf.mxu2 }
 0x357   : > { %v505_v17 = vpack.c.bf16 %v496_v15, %v496_v15 }
 0x35e   : > { %v498_v16 = vpop.f32.mrf.mxu2 }
 0x361   : > { %933 = vmatmul.msk.bf16.gmra.mxu1 %vm245_vm0, %v505_v17 }
 0x371   : > { %940 = vmatmul.msk.bf16.vlgmr.msra.gmra.mxu1 %vm245_vm0, %v698_v21 }
 0x381   : > { %941 = vmatmul.msk.bf16.gmra.mxu1 %vm245_vm0, %v700_v22  ;;  %v651_v22 = vld [vmem:[%s1260_s1 + $0x8] sm:$0xf] }
 0x3aa   : > { %v586_v23 = vpop.xlane.xlu2 %585 }
 0x3ab   : > { %v593_v24 = vsub.f32 %v575_v3, %v586_v23 }
 0x3ad   : > { %v596_v25 = vmul.f32 1.442695, %v593_v24  ;;  %v664_v24 = vsel %vm360_vm4, %v651_v22, 0 }
 0x3ae   : > { %673 = vmatpush.bf16.msra.mxu2 %v664_v24 }
 0x3af   : > { %994 = vpow2.f32 %v596_v25 }
 0x3b2   : > { %v589_v40 = vpop.xlane.xlu0 %588 }
 0x3b3   : > { %v594_v41 = vsub.f32 %v577_v9, %v589_v40 }
 0x3b5   : > { %v1202_v26 = vpop.eup %994  ;;  %v598_v43 = vmul.f32 1.442695, %v594_v41 }
 0x3b6   : > { %v602_v27 = vsel %vm276_vm1, %v1202_v26, 0.0 }
 0x3b7   : > { %603 = vadd.xlane.f32.xlu0 %v602_v27  ;;  %996 = vpow2.f32 %v598_v43 }
 0x3ba   : > { %v592_v50 = vpop.xlane.xlu0 %591 }
 0x3bb   : > { %v595_v63 = vsub.f32 %v1196_v18, %v592_v50 }
 0x3bd   : > { %v997_v46 = vpop.eup %996  ;;  %v600_v1 = vmul.f32 1.442695, %v595_v63 }
 0x3be   : > { %v605_v49 = vsel %vm276_vm1, %v997_v46, 0.0 }
 0x3cb   : > { %621 = vrot.lane.b32.xlu0 %v1136_v59, %s1036_s13 }
 0x3ce   : > { %v524_v29 = vpop.f32.mrf.mxu1 }
 0x3cf   : > { %v533_v30 = vadd.f32 %v524_v29, %v501_v28 }
 0x3d1   : > { %536 = vst.msk [vmem:[#allocation2] sm:$0xff] %vm229_vm5, %v533_v30  ;;  %v802_v30 = vld [vmem:[%s1260_s1 + $0xc] sm:$0xf] }
 0x3d3   : > { %772 = vrot.lane.b32.xlu0 %v1167_v37, %s1037_s14 }
 0x3d6   : > { %v526_v32 = vpop.f32.mrf.mxu1 }
 0x3d7   : > { %v534_v33 = vadd.f32 %v526_v32, %v502_v31  ;;  %v815_v31 = vsel %vm360_vm4, %v802_v30, 0 }
 0x3d8   : > { %v652_v50 = vld [vmem:[#allocation2] sm:$0xff] }
 0x3d9   : > { %537 = vst.msk [vmem:[#allocation2 + $0x8] sm:$0xff] %vm229_vm5, %v534_v33 }
 0x3de   : > { %v529_v35 = vpop.f32.mrf.mxu1 }
 0x3df   : > { %v535_v36 = vadd.f32 %v529_v35, %v503_v34 }
 0x3e1   : > { %538 = vst.msk [vmem:[#allocation2 + $0x10] sm:$0x1] %vm232_vm6, %v535_v36 }
 0x3e6   : > { %v531_v38 = vpop.f32.mrf.mxu1 }
 0x3ee   : > { %v726_v59 = vpop.f32.mrf.mxu1 }
 0x3ef   : > { %v735_v39 = vsel %vm276_vm1, %v726_v59, -inf }
 0x3f0   : > { %736 = vmax.xlane.f32.xlu1 %v735_v39 }
 0x3f6   : > { %v728_v42 = vpop.f32.mrf.mxu1 }
 0x3f7   : > { %v738_v37 = vsel %vm276_vm1, %v728_v42, -inf }
 0x3f8   : > { %739 = vmax.xlane.f32.xlu2 %v738_v37 }
 0x3fe   : > { %v731_v44 = vpop.f32.mrf.mxu1 }
 0x3ff   : > { %v741_v45 = vsel %vm283_vm2, %v731_v44, -inf }
 0x400   : > { %742 = vmax.xlane.f32.xlu2 %v741_v45 }
 0x406   : > { %v733_v47 = vpop.f32.mrf.mxu1 }
 0x408   : > { %606 = vadd.xlane.f32.xlu2 %v605_v49 }
 0x409   : > { %619 = vrot.lane.b32.xlu1 %v1082_v4, %s1036_s13 }
 0x411   : > { %770 = vrot.lane.b32.xlu1 %v1082_v4, %s1037_s14 }
 0x42a   : > { %v604_v51 = vpop.xlane.xlu0 %603 }
 0x43d   : > { %v622_v52 = vpop.permute.xlu0 %621 }
 0x43e   : > { %v631_v54 = vand.u32 %v622_v52, %v1123_v48 }
 0x440   : > { %639 = vmatpush.bf16.msrb.mxu3 %v631_v54  ;;  %v653_v54 = vld [vmem:[#allocation2 + $0x8] sm:$0xff] }
 0x445   : > { %v773_v57 = vpop.permute.xlu0 %772 }
 0x446   : > { %v782_v58 = vand.u32 %v773_v57, %v1123_v48 }
 0x448   : > { %790 = vmatpush.bf16.msra.mxu0 %v782_v58 }
 0x463   : > { %v737_v55 = vpop.xlane.xlu1 %736 }
 0x464   : > { %v744_v53 = vsub.f32 %v726_v59, %v737_v55 }
 0x466   : > { %v747_v56 = vmul.f32 1.442695, %v744_v53 }
 0x468   : > { %998 = vpow2.f32 %v747_v56 }
 0x46b   : > { %v740_v60 = vpop.xlane.xlu2 %739 }
 0x46c   : > { %v745_v61 = vsub.f32 %v728_v42, %v740_v60  ;;  %v654_v60 = vld [vmem:[#allocation2 + $0x10] sm:$0x1] }
 0x46e   : > { %v999_v62 = vpop.eup %998  ;;  %v749_v4 = vmul.f32 1.442695, %v745_v61 }
 0x46f   : > { %v753_v0 = vsel %vm276_vm1, %v999_v62, 0.0 }
 0x470   : > { %1000 = vpow2.f32 %v749_v4  ;;  %754 = vadd.xlane.f32.xlu2 %v753_v0 }
 0x471   : > { %1002 = vpow2.f32 %v600_v1 }
 0x473   : > { %v743_v2 = vpop.xlane.xlu2 %742 }
 0x474   : > { %v746_v3 = vsub.f32 %v731_v44, %v743_v2 }
 0x476   : > { %v1001_v5 = vpop.eup %1000  ;;  %v751_v6 = vmul.f32 1.442695, %v746_v3 }
 0x477   : > { %v756_v7 = vsel %vm276_vm1, %v1001_v5, 0.0  ;;  %v1003_v9 = vpop.eup %1002 }
 0x478   : > { %1004 = vpow2.f32 %v751_v6  ;;  %757 = vadd.xlane.f32.xlu2 %v756_v7  ;;  %v608_v12 = vsel %vm283_vm2, %v1003_v9, 0.0 }
 0x479   : > { %1006 = vrcp.f32 %v604_v51 }
 0x47b   : > { %v607_v48 = vpop.xlane.xlu2 %606  ;;  %v620_v8 = vpop.permute.xlu1 %619 }
 0x47c   : > { %1008 = vrcp.f32 %v607_v48  ;;  %640 = vmatpush.bf16.msrb.mxu3 %v620_v8 }
 0x47e   : > { %v1005_v10 = vpop.eup %1004 }
 0x47f   : > { %v759_v11 = vsel %vm283_vm2, %v1005_v10, 0.0  ;;  %v1007_v13 = vpop.eup %1006 }
 0x480   : > { %760 = vadd.xlane.f32.xlu0 %v759_v11  ;;  %609 = vadd.xlane.f32.xlu2 %v608_v12  ;;  %v614_v15 = vmul.f32 %v1007_v13, %v1202_v26 }
 0x481   : > { %824 = vmatpush.bf16.msra.mxu3 %v815_v31 }
 0x482   : > { %v1009_v14 = vpop.eup %1008 }
 0x483   : > { %v615_v16 = vmul.f32 %v1009_v14, %v997_v46  ;;  %v771_v18 = vpop.permute.xlu1 %770 }
 0x484   : > { %791 = vmatpush.bf16.msra.mxu0 %v771_v18 }
 0x485   : > { %v617_v17 = vpack.c.bf16 %v615_v16, %v614_v15 }
 0x487   : > { %936 = vmatmul.msk.bf16.vlgmr.msrb.gmra.mxu3 %vm276_vm1, %v617_v17 }
 0x4e3   : > { %v755_v19 = vpop.xlane.xlu2 %754 }
 0x4e4   : > { %1010 = vrcp.f32 %v755_v19 }
 0x4ea   : > { %v1011_v21 = vpop.eup %1010 }
 0x4eb   : > { %v758_v20 = vpop.xlane.xlu2 %757  ;;  %v765_v25 = vmul.f32 %v1011_v21, %v999_v62 }
 0x4ec   : > { %1012 = vrcp.f32 %v758_v20 }
 0x4f2   : > { %v1013_v23 = vpop.eup %1012 }
 0x4f3   : > { %v766_v26 = vmul.f32 %v1013_v23, %v1001_v5  ;;  %v610_v27 = vpop.xlane.xlu2 %609  ;;  %v761_v29 = vpop.xlane.xlu0 %760 }
 0x4f4   : > { %1014 = vrcp.f32 %v610_v27 }
 0x4f5   : > { %v768_v28 = vpack.c.bf16 %v766_v26, %v765_v25  ;;  %1016 = vrcp.f32 %v761_v29 }
 0x4f7   : > { %942 = vmatmul.msk.bf16.vlgmr.msra.gmra.mxu0 %vm276_vm1, %v768_v28 }
 0x4fa   : > { %v1015_v32 = vpop.eup %1014 }
 0x4fb   : > { %v616_v33 = vmul.f32 %v1015_v32, %v1003_v9  ;;  %v1017_v35 = vpop.eup %1016 }
 0x4fc   : > { %v767_v36 = vmul.f32 %v1017_v35, %v1005_v10 }
 0x4fd   : > { %v618_v34 = vpack.c.bf16 %v616_v33, %v616_v33 }
 0x4fe   : > { %v769_v38 = vpack.c.bf16 %v767_v36, %v767_v36 }
 0x4ff   : > { %937 = vmatmul.msk.bf16.gmra.mxu3 %vm276_vm1, %v618_v34 }
 0x507   : > { %943 = vmatmul.msk.bf16.gmra.mxu0 %vm276_vm1, %v769_v38 }
 0x50a   : > { %v642_v59 = vpop.f32.mrf.mxu3 }
 0x512   : > { %v644_v39 = vpop.f32.mrf.mxu3 }
 0x513   : > { %v655_v40 = vpack.c.bf16 %v644_v39, %v642_v59 }
 0x515   : > { %938 = vmatmul.msk.bf16.vlgmr.msra.gmra.mxu2 %vm245_vm0, %v655_v40 }
 0x574   : > { %v793_v41 = vpop.f32.mrf.mxu0 }
 0x57c   : > { %v795_v42 = vpop.f32.mrf.mxu0 }
 0x57d   : > { %v806_v37 = vpack.c.bf16 %v795_v42, %v793_v41 }
 0x57f   : > { %944 = vmatmul.msk.bf16.vlgmr.msra.gmra.mxu3 %vm245_vm0, %v806_v37 }
 0x582   : > { %v647_v43 = vpop.f32.mrf.mxu3 }
 0x583   : > { %v656_v44 = vpack.c.bf16 %v647_v43, %v647_v43 }
 0x584   : > { %v798_v45 = vpop.f32.mrf.mxu0 }
 0x585   : > { %939 = vmatmul.msk.bf16.gmra.mxu2 %vm245_vm0, %v656_v44  ;;  %v807_v49 = vpack.c.bf16 %v798_v45, %v798_v45 }
 0x58a   : > { %v649_v46 = vpop.f32.mrf.mxu3 }
 0x58c   : > { %v800_v47 = vpop.f32.mrf.mxu0 }
 0x58f   : > { %945 = vmatmul.msk.bf16.gmra.mxu3 %vm245_vm0, %v807_v49 }
 0x598   : > { %v675_v51 = vpop.f32.mrf.mxu2 }
 0x599   : > { %v684_v52 = vadd.f32 %v675_v51, %v652_v50 }
 0x59b   : > { %687 = vst.msk [vmem:[#allocation2] sm:$0xff] %vm229_vm5, %v684_v52 }
 0x5a0   : > { %v677_v55 = vpop.f32.mrf.mxu2 }
 0x5a1   : > { %v685_v53 = vadd.f32 %v677_v55, %v653_v54 }
 0x5a2   : > { %v803_v56 = vld [vmem:[#allocation2] sm:$0xff] }
 0x5a3   : > { %688 = vst.msk [vmem:[#allocation2 + $0x8] sm:$0xff] %vm229_vm5, %v685_v53 }
 0x5aa   : > { %v804_v63 = vld [vmem:[#allocation2 + $0x8] sm:$0xff] }
 0x602   : > { %v826_v57 = vpop.f32.mrf.mxu3 }
 0x603   : > { %v835_v58 = vadd.f32 %v826_v57, %v803_v56 }
 0x605   : > { %838 = vst.msk [vmem:[#allocation2] sm:$0xff] %vm229_vm5, %v835_v58 }
 0x608   : > { %v680_v61 = vpop.f32.mrf.mxu2 }
 0x609   : > { %v686_v62 = vadd.f32 %v680_v61, %v654_v60 }
 0x60a   : > { %v828_v4 = vpop.f32.mrf.mxu3 }
 0x60b   : > { %689 = vst.msk [vmem:[#allocation2 + $0x10] sm:$0x1] %vm232_vm6, %v686_v62  ;;  %v836_v0 = vadd.f32 %v828_v4, %v804_v63 }
 0x60c   : > { %v841_v1 = vld [vmem:[#allocation2] sm:$0xff] }
 0x60d   : > { %844 = vst.msk [vmem:[%s217_s23] sm:$0xff] %vm229_vm5, %v841_v1 }
 0x60e   : > { %839 = vst.msk [vmem:[#allocation2 + $0x8] sm:$0xff] %vm229_vm5, %v836_v0 }
 0x610   : > { %v682_v2 = vpop.f32.mrf.mxu2 }
 0x612   : > { %v805_v3 = vld [vmem:[#allocation2 + $0x10] sm:$0x1]  ;;  %v831_v5 = vpop.f32.mrf.mxu3 }
 0x613   : > { %v837_v6 = vadd.f32 %v831_v5, %v805_v3 }
 0x615   : > { %v842_v7 = vld [vmem:[#allocation2 + $0x8] sm:$0xff]  ;;  %840 = vst.msk [vmem:[#allocation2 + $0x10] sm:$0x1] %vm232_vm6, %v837_v6 }
 0x616   : > { %845 = vst.msk [vmem:[%s217_s23 + $0x8] sm:$0xff] %vm229_vm5, %v842_v7 }
 0x61a   : > { %v833_v48 = vpop.f32.mrf.mxu3 }
 0x61c   : > { %v843_v8 = vld [vmem:[#allocation2 + $0x10] sm:$0x1] }
 0x61d   : > { %846 = vst.msk [vmem:[%s217_s23 + $0x10] sm:$0x1] %vm232_vm6, %v843_v8 }
 0x61e PF: > { %s14_s15 = sadd.s32 1, %s1024_s15  }
 0x61f   : > { %p11_p4 = scmp.ge.s32.totalorder %s14_s15, 4  }
 0x621   :  { %13 = sbr.rel (!%p11_p4) target bundleno = 1 (0x1), region = 69 }

// kernel: decoder_forward.15
= control target key start
LH: loop header
LB: loop body
LE: loop exit
PB: predicated region body
PF: predicated region fallthrough
CT: control target
= control target key end

     0   :  { %vm43_vm0 = vcmask 254976   ;;  %vm30_vm1 = vcmask 261120   ;;  %v302_v10 = vmov 32.0   ;;  %vm177_vm12 = vcmask 253952   ;;  %s432_s0 = inlined_call_operand.vmem [shape: f32[34,32], index: 0, kind: input, shape index: {}]   ;;  %s433_s1 = inlined_call_operand.vmem [shape: f32[1,32], index: 1, kind: input, shape index: {}]   ;;  %s434_s2 = inlined_call_operand.vmem [shape: f32[1,32], index: 2, kind: input, shape index: {}]   ;;  %s435_s4 = inlined_call_operand.vmem [shape: f32[1,128], index: 4, kind: input, shape index: {}]   ;;  %s436_s3 = inlined_call_operand.vmem [shape: bf16[32,128], index: 3, kind: input, shape index: {}]   ;;  %s437_s5 = inlined_call_operand.vmem [shape: f32[34,128], index: 5, kind: output, shape index: {}]  }
   0x1   :  { %v29_v0 = vld [vmem:[%s432_s0 + $0x20] sm:$0x3]  ;;  %v26_v1 = vld [vmem:[%s432_s0 + $0x8] sm:$0xff]  ;;  %v28_v4 = vld [vmem:[%s432_s0 + $0x18] sm:$0xff]  ;;  %290 = vrcp.f32 %v302_v10  ;;  %vm172_vm13 = vcmask 257024  }
   0x2   :  { %v44_v2 = vsel %vm43_vm0, %v29_v0, 0.0  ;;  %v34_v3 = vsel %vm30_vm1, %v26_v1, 0.0  ;;  %v40_v5 = vsel %vm30_vm1, %v28_v4, 0.0  ;;  %v27_v6 = vld [vmem:[%s432_s0 + $0x10] sm:$0xff]  ;;  %v25_v7 = vld [vmem:[%s432_s0] sm:$0xff]  ;;  %v281_v48 = vld [vmem:[%s436_s3 + $0x8] sm:$0xff] }
   0x3   :  { %45 = vadd.xlane.f32.xlu0 %v44_v2  ;;  %35 = vadd.xlane.f32.xlu1 %v34_v3  ;;  %v37_v8 = vsel %vm30_vm1, %v27_v6, 0.0  ;;  %v31_v9 = vsel %vm30_vm1, %v25_v7, 0.0  ;;  %v280_v49 = vld [vmem:[%s436_s3] sm:$0xff] }
   0x4   :  { %41 = vadd.xlane.f32.xlu2 %v40_v5  ;;  %283 = vmatpush.bf16.msra.mxu2 %v281_v48 }
   0x5   :  { %233 = vmatpush.bf16.msra.mxu0 %v281_v48  ;;  %282 = vmatpush.bf16.msra.mxu1 %v281_v48 }
   0x7   :  { %v291_v11 = vpop.eup %290 }
   0x8   :  { %v48_v12 = vmul.f32 32.0, %v291_v11  ;;  %vm52_vm2 = vweird.f32 %v291_v11  ;;  %285 = vmatpush.bf16.msra.mxu2 %v280_v49 }
   0x9   :  { %234 = vmatpush.bf16.msra.mxu0 %v280_v49  ;;  %284 = vmatpush.bf16.msra.mxu1 %v280_v49 }
   0xa   :  { %v49_v13 = vsub.f32 1.0, %v48_v12 }
   0xb   :  { %38 = vadd.xlane.f32.xlu1 %v37_v8  ;;  %32 = vadd.xlane.f32.xlu0 %v31_v9  ;;  %v287_v9 = vld [vmem:[%s433_s1] ss:$0 sm:$0xff] }
   0xc   :  { %v50_v14 = vmul.f32 %v291_v11, %v49_v13 }
   0xe   :  { %v51_v15 = vadd.f32 %v291_v11, %v50_v14  ;;  %v288_v14 = vld [vmem:[%s434_s2] ss:$0 sm:$0xff] }
  0x10   :  { %v353_v16 = vsel %vm52_vm2, %v291_v11, %v51_v15 }
  0x76   :  { %v46_v17 = vpop.xlane.xlu0 %45  ;;  %v36_v18 = vpop.xlane.xlu1 %35 }
  0x77   :  { %v58_v19 = vmul.f32 %v353_v16, %v46_v17  ;;  %v55_v20 = vmul.f32 %v353_v16, %v36_v18  ;;  %v42_v25 = vpop.xlane.xlu2 %41 }
  0x78   :  { %v57_v32 = vmul.f32 %v353_v16, %v42_v25 }
  0x79   :  { %v357_v21 = vsub.f32 %v29_v0, %v58_v19  ;;  %v359_v22 = vsub.f32 %v26_v1, %v55_v20 }
  0x7a   :  { %v374_v35 = vsub.f32 %v28_v4, %v57_v32 }
  0x7b   :  { %v68_v23 = vmul.f32 %v357_v21, %v357_v21  ;;  %v65_v24 = vmul.f32 %v359_v22, %v359_v22 }
  0x7c   :  { %v67_v40 = vmul.f32 %v374_v35, %v374_v35 }
  0x7d   :  { %v81_v26 = vsel %vm43_vm0, %v68_v23, 0.0  ;;  %v72_v27 = vsel %vm30_vm1, %v65_v24, 0.0 }
  0x7e   :  { %82 = vadd.xlane.f32.xlu2 %v81_v26  ;;  %73 = vadd.xlane.f32.xlu1 %v72_v27  ;;  %v39_v28 = vpop.xlane.xlu1 %38  ;;  %v33_v29 = vpop.xlane.xlu0 %32  ;;  %v78_v41 = vsel %vm30_vm1, %v67_v40, 0.0 }
  0x7f   :  { %v56_v30 = vmul.f32 %v353_v16, %v39_v28  ;;  %v54_v31 = vmul.f32 %v353_v16, %v33_v29 }
  0x81   :  { %v370_v33 = vsub.f32 %v27_v6, %v56_v30  ;;  %v372_v34 = vsub.f32 %v25_v7, %v54_v31 }
  0x83   :  { %v66_v36 = vmul.f32 %v370_v33, %v370_v33  ;;  %v64_v37 = vmul.f32 %v372_v34, %v372_v34 }
  0x85   :  { %v75_v38 = vsel %vm30_vm1, %v66_v36, 0.0  ;;  %v69_v39 = vsel %vm30_vm1, %v64_v37, 0.0 }
  0x86   :  { %76 = vadd.xlane.f32.xlu2 %v75_v38  ;;  %70 = vadd.xlane.f32.xlu0 %v69_v39 }
  0x8e   :  { %79 = vadd.xlane.f32.xlu0 %v78_v41 }
  0xf1   :  { %v83_v42 = vpop.xlane.xlu2 %82  ;;  %v74_v43 = vpop.xlane.xlu1 %73 }
  0xf2   :  { %v88_v44 = vmul.f32 %v83_v42, %v353_v16  ;;  %v85_v45 = vmul.f32 %v74_v43, %v353_v16 }
  0xf4   :  { %v93_v46 = vadd.f32 1e-05, %v88_v44  ;;  %v90_v47 = vadd.f32 1e-05, %v85_v45 }
  0xf6   :  { %292 = vrsqrt.f32 %v93_v46  ;;  %vm110_vm4 = vweird.f32 %v90_v47  ;;  %vm140_vm6 = vweird.f32 %v93_v46 }
  0xf7   :  { %294 = vrsqrt.f32 %v90_v47 }
  0xf9   :  { %v77_v50 = vpop.xlane.xlu2 %76  ;;  %v71_v51 = vpop.xlane.xlu0 %70 }
  0xfa   :  { %v86_v52 = vmul.f32 %v77_v50, %v353_v16  ;;  %v84_v53 = vmul.f32 %v71_v51, %v353_v16 }
  0xfc   :  { %v293_v54 = vpop.eup %292  ;;  %v91_v55 = vadd.f32 1e-05, %v86_v52  ;;  %v89_v56 = vadd.f32 1e-05, %v84_v53 }
  0xfd   :  { %v295_v57 = vpop.eup %294  ;;  %v135_v58 = vmul.f32 %v293_v54, %v93_v46  ;;  %vm141_vm3 = vweird.f32 %v293_v54 }
  0xfe   :  { %v105_v59 = vmul.f32 %v295_v57, %v90_v47  ;;  %296 = vrsqrt.f32 %v91_v55  ;;  %vm111_vm5 = vweird.f32 %v295_v57  ;;  %vm142_vm7 = vmor %vm140_vm6, %vm141_vm3  ;;  %vm120_vm9 = vweird.f32 %v91_v55 }
  0xff   :  { %v136_v60 = vmul.f32 %v293_v54, %v135_v58  ;;  %298 = vrsqrt.f32 %v89_v56  ;;  %vm112_vm8 = vmor %vm110_vm4, %vm111_vm5  ;;  %vm100_vm15 = vweird.f32 %v89_v56 }
 0x100   :  { %v106_v61 = vmul.f32 %v295_v57, %v105_v59 }
 0x101   :  { %v137_v62 = vmul.f32 0.5, %v136_v60  ;;  %v80_v63 = vpop.xlane.xlu0 %79 }
 0x102   :  { %v107_v0 = vmul.f32 0.5, %v106_v61  ;;  %v87_v1 = vmul.f32 %v80_v63, %v353_v16 }
 0x103   :  { %v138_v2 = vsub.f32 1.5, %v137_v62 }
 0x104   :  { %v297_v3 = vpop.eup %296  ;;  %v108_v4 = vsub.f32 1.5, %v107_v0  ;;  %v92_v5 = vadd.f32 1e-05, %v87_v1 }
 0x105   :  { %v299_v6 = vpop.eup %298  ;;  %v139_v7 = vmul.f32 %v293_v54, %v138_v2  ;;  %v115_v8 = vmul.f32 %v297_v3, %v91_v55  ;;  %vm121_vm10 = vweird.f32 %v297_v3 }
 0x106   :  { %v109_v10 = vmul.f32 %v295_v57, %v108_v4  ;;  %v95_v11 = vmul.f32 %v299_v6, %v89_v56  ;;  %300 = vrsqrt.f32 %v92_v5  ;;  %vm101_vm11 = vweird.f32 %v299_v6  ;;  %vm122_vm14 = vmor %vm120_vm9, %vm121_vm10 }
 0x107   :  { %v143_v12 = vsel %vm142_vm7, %v293_v54, %v139_v7  ;;  %v116_v13 = vmul.f32 %v297_v3, %v115_v8  ;;  %vm102_vm0 = vmor %vm100_vm15, %vm101_vm11  ;;  %vm130_vm3 = vweird.f32 %v92_v5 }
 0x108   :  { %v148_v15 = vmul.f32 %v143_v12, %v357_v21  ;;  %v113_v16 = vsel %vm112_vm8, %v295_v57, %v109_v10  ;;  %v96_v17 = vmul.f32 %v299_v6, %v95_v11 }
 0x109   :  { %v145_v18 = vmul.f32 %v113_v16, %v359_v22  ;;  %v117_v19 = vmul.f32 0.5, %v116_v13 }
 0x10a   :  { %v157_v20 = vmul.f32 %v287_v9, %v148_v15  ;;  %v97_v23 = vmul.f32 0.5, %v96_v17 }
 0x10b   :  { %v154_v24 = vmul.f32 %v287_v9, %v145_v18  ;;  %v118_v25 = vsub.f32 1.5, %v117_v19 }
 0x10c   :  { %v301_v26 = vpop.eup %300  ;;  %v166_v27 = vadd.f32 %v288_v14, %v157_v20  ;;  %v98_v28 = vsub.f32 1.5, %v97_v23 }
 0x10d   :  { %v163_v29 = vadd.f32 %v288_v14, %v154_v24  ;;  %v119_v30 = vmul.f32 %v297_v3, %v118_v25  ;;  %v125_v31 = vmul.f32 %v301_v26, %v92_v5  ;;  %vm131_vm2 = vweird.f32 %v301_v26 }
 0x10e   :  { %v171_v21 = vpack.c.bf16 %v166_v27, %v166_v27  ;;  %v99_v32 = vmul.f32 %v299_v6, %v98_v28  ;;  %vm132_vm4 = vmor %vm130_vm3, %vm131_vm2 }
 0x10f   :  { %v168_v22 = vpack.c.bf16 %v163_v29, %v163_v29  ;;  %v123_v36 = vsel %vm122_vm14, %v297_v3, %v119_v30  ;;  %v126_v37 = vmul.f32 %v301_v26, %v125_v31 }
 0x110   :  { %178 = vst.msk [vmem:[#allocation2 + $0x10] sm:$0x1] %vm177_vm12, %v171_v21  ;;  %v146_v38 = vmul.f32 %v123_v36, %v370_v33  ;;  %v103_v39 = vsel %vm102_vm0, %v299_v6, %v99_v32 }
 0x111   :  { %174 = vst.msk [vmem:[#allocation2 + $0x4] sm:$0xf] %vm172_vm13, %v168_v22  ;;  %v144_v40 = vmul.f32 %v103_v39, %v372_v34  ;;  %v127_v41 = vmul.f32 0.5, %v126_v37 }
 0x112   :  { %v155_v42 = vmul.f32 %v287_v9, %v146_v38 }
 0x113   :  { %v153_v43 = vmul.f32 %v287_v9, %v144_v40  ;;  %v128_v44 = vsub.f32 1.5, %v127_v41 }
 0x114   :  { %v164_v45 = vadd.f32 %v288_v14, %v155_v42 }
 0x115   :  { %v162_v46 = vadd.f32 %v288_v14, %v153_v43  ;;  %v129_v47 = vmul.f32 %v301_v26, %v128_v44 }
 0x116   :  { %v169_v48 = vpack.c.bf16 %v164_v45, %v164_v45 }
 0x117   :  { %v167_v49 = vpack.c.bf16 %v162_v46, %v162_v46  ;;  %v133_v50 = vsel %vm132_vm4, %v301_v26, %v129_v47  ;;  %v183_v51 = vld [vmem:[#allocation2 + $0x10] sm:$0x1] }
 0x118   :  { %175 = vst.msk [vmem:[#allocation2 + $0x8] sm:$0xf] %vm172_vm13, %v169_v48  ;;  %v147_v33 = vmul.f32 %v133_v50, %v374_v35  ;;  %v201_v52 = vunpack.c.l.b16 %v183_v51  ;;  %v289_v35 = vld [vmem:[%s435_s4] ss:$0 sm:$0xff] }
 0x119   :  { %173 = vst.msk [vmem:[#allocation2] sm:$0xf] %vm172_vm13, %v167_v49 }
 0x11a   :  { %v156_v34 = vmul.f32 %v287_v9, %v147_v33  ;;  %v204_v53 = vpack.c.b16 %v201_v52, %v201_v52 }
 0x11c   :  { %v165_v54 = vadd.f32 %v288_v14, %v156_v34  ;;  %277 = vmatmul.msk.bf16.vlgmr.msra.gmra.mxu2 %vm30_vm1, %v204_v53 }
 0x11e   :  { %v170_v55 = vpack.c.bf16 %v165_v54, %v165_v54 }
 0x120   :  { %176 = vst.msk [vmem:[#allocation2 + $0xc] sm:$0xf] %vm172_vm13, %v170_v55  ;;  %v278_v56 = vld [vmem:[#allocation2] sm:$0xff] }
 0x121   :  { %275 = vmatmul.msk.bf16.vlgmr.msra.gmra.mxu0 %vm30_vm1, %v278_v56 }
 0x127   :  { %v279_v57 = vld [vmem:[#allocation2 + $0x8] sm:$0xff] }
 0x128   :  { %276 = vmatmul.msk.bf16.vlgmr.msra.gmra.mxu1 %vm30_vm1, %v279_v57 }
 0x19e   :  { %v236_v58 = vpop.f32.mrf.mxu0 }
 0x19f   :  { %v246_v59 = vpop.f32.mrf.mxu2  ;;  %v237_v60 = vadd.f32 %v289_v35, %v236_v58 }
 0x1a0   :  { %v247_v61 = vadd.f32 %v289_v35, %v246_v59 }
 0x1a1   :  { %250 = vst [vmem:[%s437_s5] sm:$0xff] %v237_v60 }
 0x1a2   :  { %254 = vst [vmem:[%s437_s5 + $0x20] sm:$0x3] %v247_v61 }
 0x1a5   :  { %v241_v62 = vpop.f32.mrf.mxu1 }
 0x1a6   :  { %v238_v63 = vpop.f32.mrf.mxu0  ;;  %v242_v0 = vadd.f32 %v289_v35, %v241_v62 }
 0x1a7   :  { %v248_v1 = vpop.f32.mrf.mxu2  ;;  %v239_v2 = vadd.f32 %v289_v35, %v238_v63 }
 0x1a8   :  { %252 = vst [vmem:[%s437_s5 + $0x10] sm:$0xff] %v242_v0 }
 0x1a9   :  { %251 = vst [vmem:[%s437_s5 + $0x8] sm:$0xff] %v239_v2 }
 0x1ad   :  { %v243_v3 = vpop.f32.mrf.mxu1 }
 0x1ae   :  { %v244_v4 = vadd.f32 %v289_v35, %v243_v3 }
 0x1b0   :  { %253 = vst [vmem:[%s437_s5 + $0x18] sm:$0xff] %v244_v4 }

</bundles_post_ra>
